<compile_context>
chip_gen: v7x
topology: tpu7x:2x2x1
jax: 0.10.0
libtpu: 0.0.40
codegen_flags: <defaults>
</compile_context>

<pallas_src>
import functools

import jax
import jax.numpy as jnp
import numpy as np
from jax.experimental import pallas as pl
from jax.experimental.pallas import tpu as pltpu

JACCARD_THRESHOLD = 0.5
NEGPOS_RATIO = 3
VARIANCES = (0.1, 0.2)


# --------------------------------------------------------------------------
# Plain-JAX glue: SSD box matching (per image), mirroring utils.match
# --------------------------------------------------------------------------
def point_form(boxes):
    # (cx, cy, w, h) -> (xmin, ymin, xmax, ymax)
    return jnp.concatenate(
        [boxes[:, :2] - boxes[:, 2:] / 2.0, boxes[:, :2] + boxes[:, 2:] / 2.0],
        axis=1,
    )


def jaccard(box_a, box_b):
    # box_a: (A, 4), box_b: (Bb, 4), both corner form
    max_xy = jnp.minimum(box_a[:, None, 2:], box_b[None, :, 2:])
    min_xy = jnp.maximum(box_a[:, None, :2], box_b[None, :, :2])
    wh = jnp.clip(max_xy - min_xy, 0.0)
    inter = wh[..., 0] * wh[..., 1]
    area_a = ((box_a[:, 2] - box_a[:, 0]) * (box_a[:, 3] - box_a[:, 1]))[:, None]
    area_b = ((box_b[:, 2] - box_b[:, 0]) * (box_b[:, 3] - box_b[:, 1]))[None, :]
    return inter / (area_a + area_b - inter)


def encode(matched, priors, variances):
    g_cxcy = (matched[:, :2] + matched[:, 2:]) / 2.0 - priors[:, :2]
    g_cxcy = g_cxcy / (variances[0] * priors[:, 2:])
    g_wh = (matched[:, 2:] - matched[:, :2]) / priors[:, 2:]
    g_wh = jnp.log(g_wh) / variances[1]
    return jnp.concatenate([g_cxcy, g_wh], axis=1)


def match_single(threshold, truths, labels, priors, variances):
    """Returns (loc_t, conf_t) for one image. truths: (num_obj,4), labels: (num_obj,)."""
    num_obj = truths.shape[0]
    overlaps = jaccard(truths, point_form(priors))            # (num_obj, N)
    best_prior_idx = jnp.argmax(overlaps, axis=1)             # (num_obj,)
    best_truth_overlap = jnp.max(overlaps, axis=0)            # (N,)
    best_truth_idx = jnp.argmax(overlaps, axis=0)             # (N,)
    best_truth_overlap = best_truth_overlap.at[best_prior_idx].set(2.0)
    for j in range(num_obj):                                  # sequential, mirrors torch loop
        best_truth_idx = best_truth_idx.at[best_prior_idx[j]].set(j)
    matches = truths[best_truth_idx]                          # (N, 4)
    conf = labels[best_truth_idx].astype(jnp.int32) + 1       # (N,)
    conf = jnp.where(best_truth_overlap < threshold, 0, conf)
    loc = encode(matches, priors, variances)                  # (N, 4)
    return loc, conf


# --------------------------------------------------------------------------
# Pallas kernel: per-batch smooth-L1 + cross-entropy + hard negative mining
# --------------------------------------------------------------------------
def _multibox_loss_kernel(loc_p_ref, conf_ref, loc_t_ref, label_ref, out_ref, *,
                          negpos_ratio, n_valid):
    # Lane-dense blocks: N (padded) on the last / lane axis.
    loc_p = loc_p_ref[0].astype(jnp.float32)     # (4, Np)
    conf = conf_ref[0].astype(jnp.float32)       # (C, Np)
    loc_t = loc_t_ref[0].astype(jnp.float32)     # (4, Np)
    labels = label_ref[0]                        # (1, Np) int32

    c, n_pad = conf.shape

    pos = labels > 0                             # (1, Np) bool
    num_pos_f = jnp.sum(pos.astype(jnp.float32))
    num_pos_i = num_pos_f.astype(jnp.int32)

    # ---- smooth L1 over positive dboxes (sum reduction) ----
    diff = loc_p - loc_t
    absd = jnp.abs(diff)
    sl1 = jnp.where(absd < 1.0, 0.5 * diff * diff, absd - 0.5)
    loss_l = jnp.sum(jnp.where(pos, sl1, 0.0))   # pos (1,Np) broadcasts over (4,Np)

    # ---- per-dbox softmax cross-entropy against the matched labels ----
    m = jnp.max(conf, axis=0, keepdims=True)                       # (1, Np)
    lse = m + jnp.log(jnp.sum(jnp.exp(conf - m), axis=0, keepdims=True))
    cls_iota = jax.lax.broadcasted_iota(jnp.int32, (c, n_pad), 0)  # class index / sublane
    conf_at_lbl = jnp.sum(jnp.where(cls_iota == labels, conf, 0.0),
                          axis=0, keepdims=True)
    ce = lse - conf_at_lbl                                         # (1, Np), always >= 0

    if n_valid < n_pad:  # static branch: mask padded boxes out of CE / mining
        lane_iota = jax.lax.broadcasted_iota(jnp.int32, (1, n_pad), 1)
        ce = jnp.where(lane_iota < n_valid, ce, 0.0)

    # ---- hard negative mining (exact top-k threshold, O(31*N)) ----
    # neg[i]  <=>  #{j : ce_neg[j] > ce_neg[i]} < num_neg
    #         <=>  ce_neg[i] >= (num_neg-th largest ce_neg value)
    # ce_neg >= 0, so float ordering == int32 bit-pattern ordering; the
    # threshold (k-th largest) is found exactly with 31 bisection-count steps.
    ce_neg = jnp.where(pos, 0.0, ce)
    bits = pltpu.bitcast(ce_neg, jnp.int32)                        # (1, Np)
    num_neg = jnp.minimum(num_pos_i * negpos_ratio, n_valid)

    thr = jnp.int32(0)
    for b in range(30, -1, -1):      # static 31-step unroll, scalar carry only
        cand = thr | jnp.int32(1 << b)
        cnt = jnp.sum((bits >= cand).astype(jnp.int32))
        thr = jnp.where(cnt >= num_neg, cand, thr)
    neg = bits >= thr                # (num_neg == 0 -> thr == 0x7FFFFFFF -> none)

    sel = pos | neg                  # == torch's (pos + neg).gt(0)
    loss_c = jnp.sum(jnp.where(sel, ce, 0.0))

    # lane-dense scalar packing: [loss_l, loss_c, num_pos, 0, ...]
    out_lane = jax.lax.broadcasted_iota(jnp.int32, (1, 128), 1)
    out_ref[0] = jnp.where(out_lane == 0, loss_l,
                 jnp.where(out_lane == 1, loss_c,
                 jnp.where(out_lane == 2, num_pos_f, 0.0)))


def _run_loss_kernel(loc_data, conf_data, loc_t, conf_t, negpos_ratio):
    b, n, _ = loc_data.shape
    c = conf_data.shape[2]
    n_pad = ((n + 127) // 128) * 128

    # Lane-dense layout: default-box axis N on the last (128-lane) axis.
    # (Transposes live in XLA outside the kernel; dtypes pass through so bf16
    #  conf/loc DMA at half width and are upcast inside the kernel.)
    loc_p_l = jnp.transpose(loc_data, (0, 2, 1))        # (B, 4, N)
    conf_l = jnp.transpose(conf_data, (0, 2, 1))        # (B, C, N)
    loc_t_l = jnp.transpose(loc_t, (0, 2, 1))           # (B, 4, N)
    labels_l = conf_t.astype(jnp.int32)[:, None, :]     # (B, 1, N)

    if n_pad != n:
        pad = ((0, 0), (0, 0), (0, n_pad - n))
        loc_p_l = jnp.pad(loc_p_l, pad)
        conf_l = jnp.pad(conf_l, pad)
        loc_t_l = jnp.pad(loc_t_l, pad)
        labels_l = jnp.pad(labels_l, pad)               # pads get label 0 (background)

    kernel = functools.partial(_multibox_loss_kernel,
                               negpos_ratio=negpos_ratio, n_valid=n)
    out = pl.pallas_call(
        kernel,
        out_shape=jax.ShapeDtypeStruct((b, 1, 128), jnp.float32),
        grid=(b,),
        in_specs=[
            pl.BlockSpec((1, 4, n_pad), lambda i: (i, 0, 0)),
            pl.BlockSpec((1, c, n_pad), lambda i: (i, 0, 0)),
            pl.BlockSpec((1, 4, n_pad), lambda i: (i, 0, 0)),
            pl.BlockSpec((1, 1, n_pad), lambda i: (i, 0, 0)),
        ],
        out_specs=pl.BlockSpec((1, 1, 128), lambda i: (i, 0, 0)),
        compiler_params=pltpu.CompilerParams(
            dimension_semantics=("parallel",),
            vmem_limit_bytes=32 * 1024 * 1024,   # safe on v5e/v6e/v7x; blocks are ~1-2 MiB
        ),
    )(loc_p_l, conf_l, loc_t_l, labels_l)

    loss_l_sum = jnp.sum(out[:, 0, 0])
    loss_c_sum = jnp.sum(out[:, 0, 1])
    n_pos = jnp.sum(out[:, 0, 2])
    # NOTE: matches the PyTorch module exactly — no guard for n_pos == 0.
    return loss_l_sum / n_pos, loss_c_sum / n_pos


# --------------------------------------------------------------------------
# MultiBoxLoss forward (vmapped match glue + Pallas kernel)
# --------------------------------------------------------------------------
@functools.partial(jax.jit, static_argnames=("jaccard_threshold", "neg_pos"))
def _multibox_loss_jit(loc_data, conf_data, dbox_list, targets,
                       jaccard_threshold, neg_pos):
    loc_t, conf_t = jax.vmap(
        match_single, in_axes=(None, 0, 0, None, None)
    )(jaccard_threshold, targets[:, :, :-1], targets[:, :, -1],
      dbox_list, VARIANCES)
    return _run_loss_kernel(loc_data, conf_data, loc_t, conf_t, neg_pos)


def multibox_loss(predictions, targets,
                  jaccard_threshold=JACCARD_THRESHOLD, neg_pos=NEGPOS_RATIO):
    loc_data, conf_data, dbox_list = predictions
    if isinstance(targets, (list, tuple)):
        # TODO(synk): variable-length per-image target lists would need padding
        # to a common num_obj before stacking; assume equal lengths here.
        targets = jnp.stack([jnp.asarray(t) for t in targets], axis=0)
    return _multibox_loss_jit(loc_data, conf_data, dbox_list, targets,
                              jaccard_threshold, neg_pos)


# --------------------------------------------------------------------------
# Pure-JAX reference (for sanity checking the kernel)
# --------------------------------------------------------------------------
def reference_loss(loc_data, conf_data, loc_t, conf_t, neg_pos=NEGPOS_RATIO):
    b, n, _ = conf_data.shape
    pos = conf_t > 0
    diff = loc_data - loc_t
    absd = jnp.abs(diff)
    sl1 = jnp.where(absd < 1.0, 0.5 * diff * diff, absd - 0.5)
    loss_l = jnp.sum(jnp.where(pos[..., None], sl1, 0.0))

    logp = jax.nn.log_softmax(conf_data, axis=-1)
    ce = -jnp.take_along_axis(logp, conf_t[..., None], axis=-1)[..., 0]   # (B, N)
    num_pos = jnp.sum(pos.astype(jnp.int32), axis=1)
    ce_neg = jnp.where(pos, 0.0, ce)
    loss_idx = jnp.argsort(-ce_neg, axis=1)
    idx_rank = jnp.argsort(loss_idx, axis=1)
    num_neg = jnp.minimum(num_pos * neg_pos, n)
    neg = idx_rank < num_neg[:, None]
    sel = pos | neg
    loss_c = jnp.sum(jnp.where(sel, ce, 0.0))
    n_tot = jnp.sum(num_pos).astype(jnp.float32)
    return loss_l / n_tot, loss_c / n_tot


# --------------------------------------------------------------------------
if __name__ == "__main__":
    key = jax.random.PRNGKey(0)
    B, G, C, NUM_OBJ = 2, 16, 21, 3
    N = G * G                                                  # 256 default boxes

    # Default boxes on a G x G grid, (cx, cy, w, h)
    cxy = (jnp.arange(G, dtype=jnp.float32) + 0.5) / G
    cx, cy = jnp.meshgrid(cxy, cxy, indexing="xy")
    dbox_list = jnp.stack(
        [cx.ravel(), cy.ravel(),
         jnp.full((N,), 0.15, jnp.float32), jnp.full((N,), 0.15, jnp.float32)],
        axis=1,
    )

    kc, ks, kl, k1, k2 = jax.random.split(key, 5)
    centers = jax.random.uniform(kc, (B, NUM_OBJ, 2), minval=0.25, maxval=0.75)
    halves = jax.random.uniform(ks, (B, NUM_OBJ, 2), minval=0.08, maxval=0.2)
    mins = jnp.clip(centers - halves, 0.0, 1.0)
    maxs = jnp.clip(centers + halves, 0.0, 1.0)
    gt_labels = jax.random.randint(kl, (B, NUM_OBJ), 0, 20).astype(jnp.float32)
    targets = jnp.concatenate([mins, maxs, gt_labels[..., None]], axis=-1)  # (B, NUM_OBJ, 5)

    loc_data = jax.random.normal(k1, (B, N, 4), jnp.float32) * 0.1
    conf_data = jax.random.normal(k2, (B, N, C), jnp.float32)

    loss_l, loss_c = multibox_loss((loc_data, conf_data, dbox_list), targets)
    loss_l, loss_c = jax.block_until_ready((loss_l, loss_c))

    # sanity check against pure-JAX reference
    loc_t_ref, conf_t_ref = [], []
    for i in range(B):
        lt, ct = match_single(JACCARD_THRESHOLD, targets[i][:, :-1], targets[i][:, -1],
                              dbox_list, VARIANCES)
        loc_t_ref.append(lt)
        conf_t_ref.append(ct)
    rl, rc = reference_loss(loc_data, conf_data,
                            jnp.stack(loc_t_ref), jnp.stack(conf_t_ref))
    np.testing.assert_allclose(np.asarray(loss_l), np.asarray(rl), rtol=1e-4, atol=1e-4)
    np.testing.assert_allclose(np.asarray(loss_c), np.asarray(rc), rtol=1e-4, atol=1e-4)

    print("KERNEL_OK")
</pallas_src>

<mosaic_0001>
module attributes {stable_mosaic.version = 11 : i64} {
  func.func @_multibox_loss_kernel(%arg0: i32, %arg1: memref<1x4x256xf32, #tpu.memory_space<vmem>>, %arg2: memref<1x21x256xf32, #tpu.memory_space<vmem>>, %arg3: memref<1x4x256xf32, #tpu.memory_space<vmem>>, %arg4: memref<1x1x256xi32, #tpu.memory_space<vmem>>, %arg5: memref<1x1x128xf32, #tpu.memory_space<vmem>>) attributes {dimension_semantics = [#tpu.dimension_semantics<parallel>], iteration_bounds = array<i64: 2>, scalar_prefetch = 0 : i64, scratch_operands = 0 : i64, tpu.core_type = #tpu.core_type<tc>, window_params = [{transform_indices = @transform_0, window_bounds = array<i64: 1, 4, 256>}, {transform_indices = @transform_1, window_bounds = array<i64: 1, 21, 256>}, {transform_indices = @transform_2, window_bounds = array<i64: 1, 4, 256>}, {transform_indices = @transform_3, window_bounds = array<i64: 1, 1, 256>}, {transform_indices = @transform_4, window_bounds = array<i64: 1, 1, 128>}]} {
    %c0 = arith.constant 0 : index
    %c0_0 = arith.constant 0 : index
    %c0_1 = arith.constant 0 : index
    %0 = vector.load %arg1[%c0, %c0_0, %c0_1] : memref<1x4x256xf32, #tpu.memory_space<vmem>>, vector<1x4x256xf32>
    %1 = vector.shape_cast %0 : vector<1x4x256xf32> to vector<4x256xf32>
    %c0_2 = arith.constant 0 : index
    %c0_3 = arith.constant 0 : index
    %c0_4 = arith.constant 0 : index
    %2 = vector.load %arg2[%c0_2, %c0_3, %c0_4] : memref<1x21x256xf32, #tpu.memory_space<vmem>>, vector<1x21x256xf32>
    %3 = vector.shape_cast %2 : vector<1x21x256xf32> to vector<21x256xf32>
    %c0_5 = arith.constant 0 : index
    %c0_6 = arith.constant 0 : index
    %c0_7 = arith.constant 0 : index
    %4 = vector.load %arg3[%c0_5, %c0_6, %c0_7] : memref<1x4x256xf32, #tpu.memory_space<vmem>>, vector<1x4x256xf32>
    %5 = vector.shape_cast %4 : vector<1x4x256xf32> to vector<4x256xf32>
    %c0_8 = arith.constant 0 : index
    %c0_9 = arith.constant 0 : index
    %c0_10 = arith.constant 0 : index
    %6 = vector.load %arg4[%c0_8, %c0_9, %c0_10] : memref<1x1x256xi32, #tpu.memory_space<vmem>>, vector<1x1x256xi32>
    %7 = vector.shape_cast %6 : vector<1x1x256xi32> to vector<1x256xi32>
    %c0_i32 = arith.constant 0 : i32
    %8 = vector.broadcast %c0_i32 : i32 to vector<1x256xi32>
    %9 = arith.cmpi sgt, %7, %8 : vector<1x256xi32>
    %10 = arith.extui %9 : vector<1x256xi1> to vector<1x256xi32>
    %11 = arith.sitofp %10 : vector<1x256xi32> to vector<1x256xf32>
    %12 = vector.shape_cast %11 : vector<1x256xf32> to vector<1x1x256xf32>
    %cst = arith.constant dense<0.000000e+00> : vector<1xf32>
    %13 = vector.multi_reduction <add>, %12, %cst [1, 2] : vector<1x1x256xf32> to vector<1xf32>
    %14 = vector.shape_cast %13 : vector<1xf32> to vector<1x1x1xf32>
    %15 = vector.extract %14[0, 0, 0] : f32 from vector<1x1x1xf32>
    %16 = arith.fptosi %15 : f32 to i32
    %17 = arith.subf %1, %5 : vector<4x256xf32>
    %18 = math.absf %17 : vector<4x256xf32>
    %cst_11 = arith.constant 1.000000e+00 : f32
    %19 = vector.broadcast %cst_11 : f32 to vector<4x256xf32>
    %20 = arith.cmpf olt, %18, %19 : vector<4x256xf32>
    %cst_12 = arith.constant 5.000000e-01 : f32
    %21 = vector.broadcast %cst_12 : f32 to vector<4x256xf32>
    %22 = arith.mulf %21, %17 : vector<4x256xf32>
    %23 = arith.mulf %22, %17 : vector<4x256xf32>
    %cst_13 = arith.constant 5.000000e-01 : f32
    %24 = vector.broadcast %cst_13 : f32 to vector<4x256xf32>
    %25 = arith.subf %18, %24 : vector<4x256xf32>
    %26 = arith.select %20, %23, %25 : vector<4x256xi1>, vector<4x256xf32>
    %cst_14 = arith.constant 0.000000e+00 : f32
    %27 = vector.shape_cast %9 : vector<1x256xi1> to vector<1x256xi1>
    %28 = vector.broadcast %27 : vector<1x256xi1> to vector<4x256xi1>
    %29 = vector.broadcast %cst_14 : f32 to vector<4x256xf32>
    %30 = arith.select %28, %26, %29 : vector<4x256xi1>, vector<4x256xf32>
    %31 = vector.shape_cast %30 : vector<4x256xf32> to vector<1x4x256xf32>
    %cst_15 = arith.constant dense<0.000000e+00> : vector<1xf32>
    %32 = vector.multi_reduction <add>, %31, %cst_15 [1, 2] : vector<1x4x256xf32> to vector<1xf32>
    %33 = vector.shape_cast %32 : vector<1xf32> to vector<1x1x1xf32>
    %34 = vector.extract %33[0, 0, 0] : f32 from vector<1x1x1xf32>
    %cst_16 = arith.constant dense<0xFF800000> : vector<256xf32>
    %35 = vector.multi_reduction <maximumf>, %3, %cst_16 [0] : vector<21x256xf32> to vector<256xf32>
    %36 = vector.shape_cast %35 : vector<256xf32> to vector<1x256xf32>
    %37 = vector.broadcast %36 : vector<1x256xf32> to vector<21x256xf32>
    %38 = arith.subf %3, %37 : vector<21x256xf32>
    %39 = math.exp %38 : vector<21x256xf32>
    %cst_17 = arith.constant dense<0.000000e+00> : vector<256xf32>
    %40 = vector.multi_reduction <add>, %39, %cst_17 [0] : vector<21x256xf32> to vector<256xf32>
    %41 = vector.shape_cast %40 : vector<256xf32> to vector<1x256xf32>
    %42 = math.log %41 : vector<1x256xf32>
    %43 = arith.addf %36, %42 : vector<1x256xf32>
    %44 = tpu.iota {dimensions = array<i32: 0>} : vector<21x256xi32>
    %45 = vector.broadcast %7 : vector<1x256xi32> to vector<21x256xi32>
    %46 = arith.cmpi eq, %44, %45 : vector<21x256xi32>
    %cst_18 = arith.constant 0.000000e+00 : f32
    %47 = vector.broadcast %cst_18 : f32 to vector<21x256xf32>
    %48 = arith.select %46, %3, %47 : vector<21x256xi1>, vector<21x256xf32>
    %cst_19 = arith.constant dense<0.000000e+00> : vector<256xf32>
    %49 = vector.multi_reduction <add>, %48, %cst_19 [0] : vector<21x256xf32> to vector<256xf32>
    %50 = vector.shape_cast %49 : vector<256xf32> to vector<1x256xf32>
    %51 = arith.subf %43, %50 : vector<1x256xf32>
    %cst_20 = arith.constant 0.000000e+00 : f32
    %52 = vector.broadcast %cst_20 : f32 to vector<1x256xf32>
    %53 = arith.select %9, %52, %51 : vector<1x256xi1>, vector<1x256xf32>
    %54 = tpu.bitcast %53 : vector<1x256xf32> -> vector<1x256xi32>
    %c3_i32 = arith.constant 3 : i32
    %55 = arith.muli %16, %c3_i32 : i32
    %c256_i32 = arith.constant 256 : i32
    %56 = arith.minsi %55, %c256_i32 : i32
    %c0_i32_21 = arith.constant 0 : i32
    %c1073741824_i32 = arith.constant 1073741824 : i32
    %57 = arith.ori %c0_i32_21, %c1073741824_i32 : i32
    %58 = vector.broadcast %57 : i32 to vector<1x256xi32>
    %59 = arith.cmpi sge, %54, %58 : vector<1x256xi32>
    %60 = arith.extui %59 : vector<1x256xi1> to vector<1x256xi32>
    %61 = vector.shape_cast %60 : vector<1x256xi32> to vector<1x1x256xi32>
    %cst_22 = arith.constant dense<0> : vector<1xi32>
    %62 = vector.multi_reduction <add>, %61, %cst_22 [1, 2] : vector<1x1x256xi32> to vector<1xi32>
    %63 = vector.shape_cast %62 : vector<1xi32> to vector<1x1x1xi32>
    %64 = vector.extract %63[0, 0, 0] : i32 from vector<1x1x1xi32>
    %65 = arith.cmpi sge, %64, %56 : i32
    %c0_i32_23 = arith.constant 0 : i32
    %66 = arith.select %65, %57, %c0_i32_23 : i32
    %c536870912_i32 = arith.constant 536870912 : i32
    %67 = arith.ori %66, %c536870912_i32 : i32
    %68 = vector.broadcast %67 : i32 to vector<1x256xi32>
    %69 = arith.cmpi sge, %54, %68 : vector<1x256xi32>
    %70 = arith.extui %69 : vector<1x256xi1> to vector<1x256xi32>
    %71 = vector.shape_cast %70 : vector<1x256xi32> to vector<1x1x256xi32>
    %cst_24 = arith.constant dense<0> : vector<1xi32>
    %72 = vector.multi_reduction <add>, %71, %cst_24 [1, 2] : vector<1x1x256xi32> to vector<1xi32>
    %73 = vector.shape_cast %72 : vector<1xi32> to vector<1x1x1xi32>
    %74 = vector.extract %73[0, 0, 0] : i32 from vector<1x1x1xi32>
    %75 = arith.cmpi sge, %74, %56 : i32
    %76 = arith.select %75, %67, %66 : i32
    %c268435456_i32 = arith.constant 268435456 : i32
    %77 = arith.ori %76, %c268435456_i32 : i32
    %78 = vector.broadcast %77 : i32 to vector<1x256xi32>
    %79 = arith.cmpi sge, %54, %78 : vector<1x256xi32>
    %80 = arith.extui %79 : vector<1x256xi1> to vector<1x256xi32>
    %81 = vector.shape_cast %80 : vector<1x256xi32> to vector<1x1x256xi32>
    %cst_25 = arith.constant dense<0> : vector<1xi32>
    %82 = vector.multi_reduction <add>, %81, %cst_25 [1, 2] : vector<1x1x256xi32> to vector<1xi32>
    %83 = vector.shape_cast %82 : vector<1xi32> to vector<1x1x1xi32>
    %84 = vector.extract %83[0, 0, 0] : i32 from vector<1x1x1xi32>
    %85 = arith.cmpi sge, %84, %56 : i32
    %86 = arith.select %85, %77, %76 : i32
    %c134217728_i32 = arith.constant 134217728 : i32
    %87 = arith.ori %86, %c134217728_i32 : i32
    %88 = vector.broadcast %87 : i32 to vector<1x256xi32>
    %89 = arith.cmpi sge, %54, %88 : vector<1x256xi32>
    %90 = arith.extui %89 : vector<1x256xi1> to vector<1x256xi32>
    %91 = vector.shape_cast %90 : vector<1x256xi32> to vector<1x1x256xi32>
    %cst_26 = arith.constant dense<0> : vector<1xi32>
    %92 = vector.multi_reduction <add>, %91, %cst_26 [1, 2] : vector<1x1x256xi32> to vector<1xi32>
    %93 = vector.shape_cast %92 : vector<1xi32> to vector<1x1x1xi32>
    %94 = vector.extract %93[0, 0, 0] : i32 from vector<1x1x1xi32>
    %95 = arith.cmpi sge, %94, %56 : i32
    %96 = arith.select %95, %87, %86 : i32
    %c67108864_i32 = arith.constant 67108864 : i32
    %97 = arith.ori %96, %c67108864_i32 : i32
    %98 = vector.broadcast %97 : i32 to vector<1x256xi32>
    %99 = arith.cmpi sge, %54, %98 : vector<1x256xi32>
    %100 = arith.extui %99 : vector<1x256xi1> to vector<1x256xi32>
    %101 = vector.shape_cast %100 : vector<1x256xi32> to vector<1x1x256xi32>
    %cst_27 = arith.constant dense<0> : vector<1xi32>
    %102 = vector.multi_reduction <add>, %101, %cst_27 [1, 2] : vector<1x1x256xi32> to vector<1xi32>
    %103 = vector.shape_cast %102 : vector<1xi32> to vector<1x1x1xi32>
    %104 = vector.extract %103[0, 0, 0] : i32 from vector<1x1x1xi32>
    %105 = arith.cmpi sge, %104, %56 : i32
    %106 = arith.select %105, %97, %96 : i32
    %c33554432_i32 = arith.constant 33554432 : i32
    %107 = arith.ori %106, %c33554432_i32 : i32
    %108 = vector.broadcast %107 : i32 to vector<1x256xi32>
    %109 = arith.cmpi sge, %54, %108 : vector<1x256xi32>
    %110 = arith.extui %109 : vector<1x256xi1> to vector<1x256xi32>
    %111 = vector.shape_cast %110 : vector<1x256xi32> to vector<1x1x256xi32>
    %cst_28 = arith.constant dense<0> : vector<1xi32>
    %112 = vector.multi_reduction <add>, %111, %cst_28 [1, 2] : vector<1x1x256xi32> to vector<1xi32>
    %113 = vector.shape_cast %112 : vector<1xi32> to vector<1x1x1xi32>
    %114 = vector.extract %113[0, 0, 0] : i32 from vector<1x1x1xi32>
    %115 = arith.cmpi sge, %114, %56 : i32
    %116 = arith.select %115, %107, %106 : i32
    %c16777216_i32 = arith.constant 16777216 : i32
    %117 = arith.ori %116, %c16777216_i32 : i32
    %118 = vector.broadcast %117 : i32 to vector<1x256xi32>
    %119 = arith.cmpi sge, %54, %118 : vector<1x256xi32>
    %120 = arith.extui %119 : vector<1x256xi1> to vector<1x256xi32>
    %121 = vector.shape_cast %120 : vector<1x256xi32> to vector<1x1x256xi32>
    %cst_29 = arith.constant dense<0> : vector<1xi32>
    %122 = vector.multi_reduction <add>, %121, %cst_29 [1, 2] : vector<1x1x256xi32> to vector<1xi32>
    %123 = vector.shape_cast %122 : vector<1xi32> to vector<1x1x1xi32>
    %124 = vector.extract %123[0, 0, 0] : i32 from vector<1x1x1xi32>
    %125 = arith.cmpi sge, %124, %56 : i32
    %126 = arith.select %125, %117, %116 : i32
    %c8388608_i32 = arith.constant 8388608 : i32
    %127 = arith.ori %126, %c8388608_i32 : i32
    %128 = vector.broadcast %127 : i32 to vector<1x256xi32>
    %129 = arith.cmpi sge, %54, %128 : vector<1x256xi32>
    %130 = arith.extui %129 : vector<1x256xi1> to vector<1x256xi32>
    %131 = vector.shape_cast %130 : vector<1x256xi32> to vector<1x1x256xi32>
    %cst_30 = arith.constant dense<0> : vector<1xi32>
    %132 = vector.multi_reduction <add>, %131, %cst_30 [1, 2] : vector<1x1x256xi32> to vector<1xi32>
    %133 = vector.shape_cast %132 : vector<1xi32> to vector<1x1x1xi32>
    %134 = vector.extract %133[0, 0, 0] : i32 from vector<1x1x1xi32>
    %135 = arith.cmpi sge, %134, %56 : i32
    %136 = arith.select %135, %127, %126 : i32
    %c4194304_i32 = arith.constant 4194304 : i32
    %137 = arith.ori %136, %c4194304_i32 : i32
    %138 = vector.broadcast %137 : i32 to vector<1x256xi32>
    %139 = arith.cmpi sge, %54, %138 : vector<1x256xi32>
    %140 = arith.extui %139 : vector<1x256xi1> to vector<1x256xi32>
    %141 = vector.shape_cast %140 : vector<1x256xi32> to vector<1x1x256xi32>
    %cst_31 = arith.constant dense<0> : vector<1xi32>
    %142 = vector.multi_reduction <add>, %141, %cst_31 [1, 2] : vector<1x1x256xi32> to vector<1xi32>
    %143 = vector.shape_cast %142 : vector<1xi32> to vector<1x1x1xi32>
    %144 = vector.extract %143[0, 0, 0] : i32 from vector<1x1x1xi32>
    %145 = arith.cmpi sge, %144, %56 : i32
    %146 = arith.select %145, %137, %136 : i32
    %c2097152_i32 = arith.constant 2097152 : i32
    %147 = arith.ori %146, %c2097152_i32 : i32
    %148 = vector.broadcast %147 : i32 to vector<1x256xi32>
    %149 = arith.cmpi sge, %54, %148 : vector<1x256xi32>
    %150 = arith.extui %149 : vector<1x256xi1> to vector<1x256xi32>
    %151 = vector.shape_cast %150 : vector<1x256xi32> to vector<1x1x256xi32>
    %cst_32 = arith.constant dense<0> : vector<1xi32>
    %152 = vector.multi_reduction <add>, %151, %cst_32 [1, 2] : vector<1x1x256xi32> to vector<1xi32>
    %153 = vector.shape_cast %152 : vector<1xi32> to vector<1x1x1xi32>
    %154 = vector.extract %153[0, 0, 0] : i32 from vector<1x1x1xi32>
    %155 = arith.cmpi sge, %154, %56 : i32
    %156 = arith.select %155, %147, %146 : i32
    %c1048576_i32 = arith.constant 1048576 : i32
    %157 = arith.ori %156, %c1048576_i32 : i32
    %158 = vector.broadcast %157 : i32 to vector<1x256xi32>
    %159 = arith.cmpi sge, %54, %158 : vector<1x256xi32>
    %160 = arith.extui %159 : vector<1x256xi1> to vector<1x256xi32>
    %161 = vector.shape_cast %160 : vector<1x256xi32> to vector<1x1x256xi32>
    %cst_33 = arith.constant dense<0> : vector<1xi32>
    %162 = vector.multi_reduction <add>, %161, %cst_33 [1, 2] : vector<1x1x256xi32> to vector<1xi32>
    %163 = vector.shape_cast %162 : vector<1xi32> to vector<1x1x1xi32>
    %164 = vector.extract %163[0, 0, 0] : i32 from vector<1x1x1xi32>
    %165 = arith.cmpi sge, %164, %56 : i32
    %166 = arith.select %165, %157, %156 : i32
    %c524288_i32 = arith.constant 524288 : i32
    %167 = arith.ori %166, %c524288_i32 : i32
    %168 = vector.broadcast %167 : i32 to vector<1x256xi32>
    %169 = arith.cmpi sge, %54, %168 : vector<1x256xi32>
    %170 = arith.extui %169 : vector<1x256xi1> to vector<1x256xi32>
    %171 = vector.shape_cast %170 : vector<1x256xi32> to vector<1x1x256xi32>
    %cst_34 = arith.constant dense<0> : vector<1xi32>
    %172 = vector.multi_reduction <add>, %171, %cst_34 [1, 2] : vector<1x1x256xi32> to vector<1xi32>
    %173 = vector.shape_cast %172 : vector<1xi32> to vector<1x1x1xi32>
    %174 = vector.extract %173[0, 0, 0] : i32 from vector<1x1x1xi32>
    %175 = arith.cmpi sge, %174, %56 : i32
    %176 = arith.select %175, %167, %166 : i32
    %c262144_i32 = arith.constant 262144 : i32
    %177 = arith.ori %176, %c262144_i32 : i32
    %178 = vector.broadcast %177 : i32 to vector<1x256xi32>
    %179 = arith.cmpi sge, %54, %178 : vector<1x256xi32>
    %180 = arith.extui %179 : vector<1x256xi1> to vector<1x256xi32>
    %181 = vector.shape_cast %180 : vector<1x256xi32> to vector<1x1x256xi32>
    %cst_35 = arith.constant dense<0> : vector<1xi32>
    %182 = vector.multi_reduction <add>, %181, %cst_35 [1, 2] : vector<1x1x256xi32> to vector<1xi32>
    %183 = vector.shape_cast %182 : vector<1xi32> to vector<1x1x1xi32>
    %184 = vector.extract %183[0, 0, 0] : i32 from vector<1x1x1xi32>
    %185 = arith.cmpi sge, %184, %56 : i32
    %186 = arith.select %185, %177, %176 : i32
    %c131072_i32 = arith.constant 131072 : i32
    %187 = arith.ori %186, %c131072_i32 : i32
    %188 = vector.broadcast %187 : i32 to vector<1x256xi32>
    %189 = arith.cmpi sge, %54, %188 : vector<1x256xi32>
    %190 = arith.extui %189 : vector<1x256xi1> to vector<1x256xi32>
    %191 = vector.shape_cast %190 : vector<1x256xi32> to vector<1x1x256xi32>
    %cst_36 = arith.constant dense<0> : vector<1xi32>
    %192 = vector.multi_reduction <add>, %191, %cst_36 [1, 2] : vector<1x1x256xi32> to vector<1xi32>
    %193 = vector.shape_cast %192 : vector<1xi32> to vector<1x1x1xi32>
    %194 = vector.extract %193[0, 0, 0] : i32 from vector<1x1x1xi32>
    %195 = arith.cmpi sge, %194, %56 : i32
    %196 = arith.select %195, %187, %186 : i32
    %c65536_i32 = arith.constant 65536 : i32
    %197 = arith.ori %196, %c65536_i32 : i32
    %198 = vector.broadcast %197 : i32 to vector<1x256xi32>
    %199 = arith.cmpi sge, %54, %198 : vector<1x256xi32>
    %200 = arith.extui %199 : vector<1x256xi1> to vector<1x256xi32>
    %201 = vector.shape_cast %200 : vector<1x256xi32> to vector<1x1x256xi32>
    %cst_37 = arith.constant dense<0> : vector<1xi32>
    %202 = vector.multi_reduction <add>, %201, %cst_37 [1, 2] : vector<1x1x256xi32> to vector<1xi32>
    %203 = vector.shape_cast %202 : vector<1xi32> to vector<1x1x1xi32>
    %204 = vector.extract %203[0, 0, 0] : i32 from vector<1x1x1xi32>
    %205 = arith.cmpi sge, %204, %56 : i32
    %206 = arith.select %205, %197, %196 : i32
    %c32768_i32 = arith.constant 32768 : i32
    %207 = arith.ori %206, %c32768_i32 : i32
    %208 = vector.broadcast %207 : i32 to vector<1x256xi32>
    %209 = arith.cmpi sge, %54, %208 : vector<1x256xi32>
    %210 = arith.extui %209 : vector<1x256xi1> to vector<1x256xi32>
    %211 = vector.shape_cast %210 : vector<1x256xi32> to vector<1x1x256xi32>
    %cst_38 = arith.constant dense<0> : vector<1xi32>
    %212 = vector.multi_reduction <add>, %211, %cst_38 [1, 2] : vector<1x1x256xi32> to vector<1xi32>
    %213 = vector.shape_cast %212 : vector<1xi32> to vector<1x1x1xi32>
    %214 = vector.extract %213[0, 0, 0] : i32 from vector<1x1x1xi32>
    %215 = arith.cmpi sge, %214, %56 : i32
    %216 = arith.select %215, %207, %206 : i32
    %c16384_i32 = arith.constant 16384 : i32
    %217 = arith.ori %216, %c16384_i32 : i32
    %218 = vector.broadcast %217 : i32 to vector<1x256xi32>
    %219 = arith.cmpi sge, %54, %218 : vector<1x256xi32>
    %220 = arith.extui %219 : vector<1x256xi1> to vector<1x256xi32>
    %221 = vector.shape_cast %220 : vector<1x256xi32> to vector<1x1x256xi32>
    %cst_39 = arith.constant dense<0> : vector<1xi32>
    %222 = vector.multi_reduction <add>, %221, %cst_39 [1, 2] : vector<1x1x256xi32> to vector<1xi32>
    %223 = vector.shape_cast %222 : vector<1xi32> to vector<1x1x1xi32>
    %224 = vector.extract %223[0, 0, 0] : i32 from vector<1x1x1xi32>
    %225 = arith.cmpi sge, %224, %56 : i32
    %226 = arith.select %225, %217, %216 : i32
    %c8192_i32 = arith.constant 8192 : i32
    %227 = arith.ori %226, %c8192_i32 : i32
    %228 = vector.broadcast %227 : i32 to vector<1x256xi32>
    %229 = arith.cmpi sge, %54, %228 : vector<1x256xi32>
    %230 = arith.extui %229 : vector<1x256xi1> to vector<1x256xi32>
    %231 = vector.shape_cast %230 : vector<1x256xi32> to vector<1x1x256xi32>
    %cst_40 = arith.constant dense<0> : vector<1xi32>
    %232 = vector.multi_reduction <add>, %231, %cst_40 [1, 2] : vector<1x1x256xi32> to vector<1xi32>
    %233 = vector.shape_cast %232 : vector<1xi32> to vector<1x1x1xi32>
    %234 = vector.extract %233[0, 0, 0] : i32 from vector<1x1x1xi32>
    %235 = arith.cmpi sge, %234, %56 : i32
    %236 = arith.select %235, %227, %226 : i32
    %c4096_i32 = arith.constant 4096 : i32
    %237 = arith.ori %236, %c4096_i32 : i32
    %238 = vector.broadcast %237 : i32 to vector<1x256xi32>
    %239 = arith.cmpi sge, %54, %238 : vector<1x256xi32>
    %240 = arith.extui %239 : vector<1x256xi1> to vector<1x256xi32>
    %241 = vector.shape_cast %240 : vector<1x256xi32> to vector<1x1x256xi32>
    %cst_41 = arith.constant dense<0> : vector<1xi32>
    %242 = vector.multi_reduction <add>, %241, %cst_41 [1, 2] : vector<1x1x256xi32> to vector<1xi32>
    %243 = vector.shape_cast %242 : vector<1xi32> to vector<1x1x1xi32>
    %244 = vector.extract %243[0, 0, 0] : i32 from vector<1x1x1xi32>
    %245 = arith.cmpi sge, %244, %56 : i32
    %246 = arith.select %245, %237, %236 : i32
    %c2048_i32 = arith.constant 2048 : i32
    %247 = arith.ori %246, %c2048_i32 : i32
    %248 = vector.broadcast %247 : i32 to vector<1x256xi32>
    %249 = arith.cmpi sge, %54, %248 : vector<1x256xi32>
    %250 = arith.extui %249 : vector<1x256xi1> to vector<1x256xi32>
    %251 = vector.shape_cast %250 : vector<1x256xi32> to vector<1x1x256xi32>
    %cst_42 = arith.constant dense<0> : vector<1xi32>
    %252 = vector.multi_reduction <add>, %251, %cst_42 [1, 2] : vector<1x1x256xi32> to vector<1xi32>
    %253 = vector.shape_cast %252 : vector<1xi32> to vector<1x1x1xi32>
    %254 = vector.extract %253[0, 0, 0] : i32 from vector<1x1x1xi32>
    %255 = arith.cmpi sge, %254, %56 : i32
    %256 = arith.select %255, %247, %246 : i32
    %c1024_i32 = arith.constant 1024 : i32
    %257 = arith.ori %256, %c1024_i32 : i32
    %258 = vector.broadcast %257 : i32 to vector<1x256xi32>
    %259 = arith.cmpi sge, %54, %258 : vector<1x256xi32>
    %260 = arith.extui %259 : vector<1x256xi1> to vector<1x256xi32>
    %261 = vector.shape_cast %260 : vector<1x256xi32> to vector<1x1x256xi32>
    %cst_43 = arith.constant dense<0> : vector<1xi32>
    %262 = vector.multi_reduction <add>, %261, %cst_43 [1, 2] : vector<1x1x256xi32> to vector<1xi32>
    %263 = vector.shape_cast %262 : vector<1xi32> to vector<1x1x1xi32>
    %264 = vector.extract %263[0, 0, 0] : i32 from vector<1x1x1xi32>
    %265 = arith.cmpi sge, %264, %56 : i32
    %266 = arith.select %265, %257, %256 : i32
    %c512_i32 = arith.constant 512 : i32
    %267 = arith.ori %266, %c512_i32 : i32
    %268 = vector.broadcast %267 : i32 to vector<1x256xi32>
    %269 = arith.cmpi sge, %54, %268 : vector<1x256xi32>
    %270 = arith.extui %269 : vector<1x256xi1> to vector<1x256xi32>
    %271 = vector.shape_cast %270 : vector<1x256xi32> to vector<1x1x256xi32>
    %cst_44 = arith.constant dense<0> : vector<1xi32>
    %272 = vector.multi_reduction <add>, %271, %cst_44 [1, 2] : vector<1x1x256xi32> to vector<1xi32>
    %273 = vector.shape_cast %272 : vector<1xi32> to vector<1x1x1xi32>
    %274 = vector.extract %273[0, 0, 0] : i32 from vector<1x1x1xi32>
    %275 = arith.cmpi sge, %274, %56 : i32
    %276 = arith.select %275, %267, %266 : i32
    %c256_i32_45 = arith.constant 256 : i32
    %277 = arith.ori %276, %c256_i32_45 : i32
    %278 = vector.broadcast %277 : i32 to vector<1x256xi32>
    %279 = arith.cmpi sge, %54, %278 : vector<1x256xi32>
    %280 = arith.extui %279 : vector<1x256xi1> to vector<1x256xi32>
    %281 = vector.shape_cast %280 : vector<1x256xi32> to vector<1x1x256xi32>
    %cst_46 = arith.constant dense<0> : vector<1xi32>
    %282 = vector.multi_reduction <add>, %281, %cst_46 [1, 2] : vector<1x1x256xi32> to vector<1xi32>
    %283 = vector.shape_cast %282 : vector<1xi32> to vector<1x1x1xi32>
    %284 = vector.extract %283[0, 0, 0] : i32 from vector<1x1x1xi32>
    %285 = arith.cmpi sge, %284, %56 : i32
    %286 = arith.select %285, %277, %276 : i32
    %c128_i32 = arith.constant 128 : i32
    %287 = arith.ori %286, %c128_i32 : i32
    %288 = vector.broadcast %287 : i32 to vector<1x256xi32>
    %289 = arith.cmpi sge, %54, %288 : vector<1x256xi32>
    %290 = arith.extui %289 : vector<1x256xi1> to vector<1x256xi32>
    %291 = vector.shape_cast %290 : vector<1x256xi32> to vector<1x1x256xi32>
    %cst_47 = arith.constant dense<0> : vector<1xi32>
    %292 = vector.multi_reduction <add>, %291, %cst_47 [1, 2] : vector<1x1x256xi32> to vector<1xi32>
    %293 = vector.shape_cast %292 : vector<1xi32> to vector<1x1x1xi32>
    %294 = vector.extract %293[0, 0, 0] : i32 from vector<1x1x1xi32>
    %295 = arith.cmpi sge, %294, %56 : i32
    %296 = arith.select %295, %287, %286 : i32
    %c64_i32 = arith.constant 64 : i32
    %297 = arith.ori %296, %c64_i32 : i32
    %298 = vector.broadcast %297 : i32 to vector<1x256xi32>
    %299 = arith.cmpi sge, %54, %298 : vector<1x256xi32>
    %300 = arith.extui %299 : vector<1x256xi1> to vector<1x256xi32>
    %301 = vector.shape_cast %300 : vector<1x256xi32> to vector<1x1x256xi32>
    %cst_48 = arith.constant dense<0> : vector<1xi32>
    %302 = vector.multi_reduction <add>, %301, %cst_48 [1, 2] : vector<1x1x256xi32> to vector<1xi32>
    %303 = vector.shape_cast %302 : vector<1xi32> to vector<1x1x1xi32>
    %304 = vector.extract %303[0, 0, 0] : i32 from vector<1x1x1xi32>
    %305 = arith.cmpi sge, %304, %56 : i32
    %306 = arith.select %305, %297, %296 : i32
    %c32_i32 = arith.constant 32 : i32
    %307 = arith.ori %306, %c32_i32 : i32
    %308 = vector.broadcast %307 : i32 to vector<1x256xi32>
    %309 = arith.cmpi sge, %54, %308 : vector<1x256xi32>
    %310 = arith.extui %309 : vector<1x256xi1> to vector<1x256xi32>
    %311 = vector.shape_cast %310 : vector<1x256xi32> to vector<1x1x256xi32>
    %cst_49 = arith.constant dense<0> : vector<1xi32>
    %312 = vector.multi_reduction <add>, %311, %cst_49 [1, 2] : vector<1x1x256xi32> to vector<1xi32>
    %313 = vector.shape_cast %312 : vector<1xi32> to vector<1x1x1xi32>
    %314 = vector.extract %313[0, 0, 0] : i32 from vector<1x1x1xi32>
    %315 = arith.cmpi sge, %314, %56 : i32
    %316 = arith.select %315, %307, %306 : i32
    %c16_i32 = arith.constant 16 : i32
    %317 = arith.ori %316, %c16_i32 : i32
    %318 = vector.broadcast %317 : i32 to vector<1x256xi32>
    %319 = arith.cmpi sge, %54, %318 : vector<1x256xi32>
    %320 = arith.extui %319 : vector<1x256xi1> to vector<1x256xi32>
    %321 = vector.shape_cast %320 : vector<1x256xi32> to vector<1x1x256xi32>
    %cst_50 = arith.constant dense<0> : vector<1xi32>
    %322 = vector.multi_reduction <add>, %321, %cst_50 [1, 2] : vector<1x1x256xi32> to vector<1xi32>
    %323 = vector.shape_cast %322 : vector<1xi32> to vector<1x1x1xi32>
    %324 = vector.extract %323[0, 0, 0] : i32 from vector<1x1x1xi32>
    %325 = arith.cmpi sge, %324, %56 : i32
    %326 = arith.select %325, %317, %316 : i32
    %c8_i32 = arith.constant 8 : i32
    %327 = arith.ori %326, %c8_i32 : i32
    %328 = vector.broadcast %327 : i32 to vector<1x256xi32>
    %329 = arith.cmpi sge, %54, %328 : vector<1x256xi32>
    %330 = arith.extui %329 : vector<1x256xi1> to vector<1x256xi32>
    %331 = vector.shape_cast %330 : vector<1x256xi32> to vector<1x1x256xi32>
    %cst_51 = arith.constant dense<0> : vector<1xi32>
    %332 = vector.multi_reduction <add>, %331, %cst_51 [1, 2] : vector<1x1x256xi32> to vector<1xi32>
    %333 = vector.shape_cast %332 : vector<1xi32> to vector<1x1x1xi32>
    %334 = vector.extract %333[0, 0, 0] : i32 from vector<1x1x1xi32>
    %335 = arith.cmpi sge, %334, %56 : i32
    %336 = arith.select %335, %327, %326 : i32
    %c4_i32 = arith.constant 4 : i32
    %337 = arith.ori %336, %c4_i32 : i32
    %338 = vector.broadcast %337 : i32 to vector<1x256xi32>
    %339 = arith.cmpi sge, %54, %338 : vector<1x256xi32>
    %340 = arith.extui %339 : vector<1x256xi1> to vector<1x256xi32>
    %341 = vector.shape_cast %340 : vector<1x256xi32> to vector<1x1x256xi32>
    %cst_52 = arith.constant dense<0> : vector<1xi32>
    %342 = vector.multi_reduction <add>, %341, %cst_52 [1, 2] : vector<1x1x256xi32> to vector<1xi32>
    %343 = vector.shape_cast %342 : vector<1xi32> to vector<1x1x1xi32>
    %344 = vector.extract %343[0, 0, 0] : i32 from vector<1x1x1xi32>
    %345 = arith.cmpi sge, %344, %56 : i32
    %346 = arith.select %345, %337, %336 : i32
    %c2_i32 = arith.constant 2 : i32
    %347 = arith.ori %346, %c2_i32 : i32
    %348 = vector.broadcast %347 : i32 to vector<1x256xi32>
    %349 = arith.cmpi sge, %54, %348 : vector<1x256xi32>
    %350 = arith.extui %349 : vector<1x256xi1> to vector<1x256xi32>
    %351 = vector.shape_cast %350 : vector<1x256xi32> to vector<1x1x256xi32>
    %cst_53 = arith.constant dense<0> : vector<1xi32>
    %352 = vector.multi_reduction <add>, %351, %cst_53 [1, 2] : vector<1x1x256xi32> to vector<1xi32>
    %353 = vector.shape_cast %352 : vector<1xi32> to vector<1x1x1xi32>
    %354 = vector.extract %353[0, 0, 0] : i32 from vector<1x1x1xi32>
    %355 = arith.cmpi sge, %354, %56 : i32
    %356 = arith.select %355, %347, %346 : i32
    %c1_i32 = arith.constant 1 : i32
    %357 = arith.ori %356, %c1_i32 : i32
    %358 = vector.broadcast %357 : i32 to vector<1x256xi32>
    %359 = arith.cmpi sge, %54, %358 : vector<1x256xi32>
    %360 = arith.extui %359 : vector<1x256xi1> to vector<1x256xi32>
    %361 = vector.shape_cast %360 : vector<1x256xi32> to vector<1x1x256xi32>
    %cst_54 = arith.constant dense<0> : vector<1xi32>
    %362 = vector.multi_reduction <add>, %361, %cst_54 [1, 2] : vector<1x1x256xi32> to vector<1xi32>
    %363 = vector.shape_cast %362 : vector<1xi32> to vector<1x1x1xi32>
    %364 = vector.extract %363[0, 0, 0] : i32 from vector<1x1x1xi32>
    %365 = arith.cmpi sge, %364, %56 : i32
    %366 = arith.select %365, %357, %356 : i32
    %367 = vector.broadcast %366 : i32 to vector<1x256xi32>
    %368 = arith.cmpi sge, %54, %367 : vector<1x256xi32>
    %369 = arith.ori %9, %368 : vector<1x256xi1>
    %cst_55 = arith.constant 0.000000e+00 : f32
    %370 = vector.broadcast %cst_55 : f32 to vector<1x256xf32>
    %371 = arith.select %369, %51, %370 : vector<1x256xi1>, vector<1x256xf32>
    %372 = vector.shape_cast %371 : vector<1x256xf32> to vector<1x1x256xf32>
    %cst_56 = arith.constant dense<0.000000e+00> : vector<1xf32>
    %373 = vector.multi_reduction <add>, %372, %cst_56 [1, 2] : vector<1x1x256xf32> to vector<1xf32>
    %374 = vector.shape_cast %373 : vector<1xf32> to vector<1x1x1xf32>
    %375 = vector.extract %374[0, 0, 0] : f32 from vector<1x1x1xf32>
    %376 = tpu.iota {dimensions = array<i32: 1>} : vector<1x128xi32>
    %c0_i32_57 = arith.constant 0 : i32
    %377 = vector.broadcast %c0_i32_57 : i32 to vector<1x128xi32>
    %378 = arith.cmpi eq, %376, %377 : vector<1x128xi32>
    %c1_i32_58 = arith.constant 1 : i32
    %379 = vector.broadcast %c1_i32_58 : i32 to vector<1x128xi32>
    %380 = arith.cmpi eq, %376, %379 : vector<1x128xi32>
    %c2_i32_59 = arith.constant 2 : i32
    %381 = vector.broadcast %c2_i32_59 : i32 to vector<1x128xi32>
    %382 = arith.cmpi eq, %376, %381 : vector<1x128xi32>
    %cst_60 = arith.constant 0.000000e+00 : f32
    %383 = vector.broadcast %15 : f32 to vector<1x128xf32>
    %384 = vector.broadcast %cst_60 : f32 to vector<1x128xf32>
    %385 = arith.select %382, %383, %384 : vector<1x128xi1>, vector<1x128xf32>
    %386 = vector.broadcast %375 : f32 to vector<1x128xf32>
    %387 = arith.select %380, %386, %385 : vector<1x128xi1>, vector<1x128xf32>
    %388 = vector.broadcast %34 : f32 to vector<1x128xf32>
    %389 = arith.select %378, %388, %387 : vector<1x128xi1>, vector<1x128xf32>
    %c0_61 = arith.constant 0 : index
    %c0_62 = arith.constant 0 : index
    %c0_63 = arith.constant 0 : index
    %390 = vector.load %arg5[%c0_61, %c0_62, %c0_63] : memref<1x1x128xf32, #tpu.memory_space<vmem>>, vector<1x1x128xf32>
    %391 = vector.shape_cast %390 : vector<1x1x128xf32> to vector<1x128xf32>
    %392 = vector.shape_cast %389 : vector<1x128xf32> to vector<1x1x128xf32>
    tpu.vector_store %arg5[%c0_61, %c0_62, %c0_63], %392 {strides = array<i32>} : memref<1x1x128xf32, #tpu.memory_space<vmem>>, vector<1x1x128xf32>,
    return
  }
  func.func @transform_0(%arg0: i32) -> (i32, i32, i32) {
    %c0_i32 = arith.constant 0 : i32
    %c0_i32_0 = arith.constant 0 : i32
    %c0_i32_1 = arith.constant 0 : i32
    return %arg0, %c0_i32, %c0_i32_0 : i32, i32, i32
  }
  func.func @transform_1(%arg0: i32) -> (i32, i32, i32) {
    %c0_i32 = arith.constant 0 : i32
    %c0_i32_0 = arith.constant 0 : i32
    %c0_i32_1 = arith.constant 0 : i32
    return %arg0, %c0_i32, %c0_i32_0 : i32, i32, i32
  }
  func.func @transform_2(%arg0: i32) -> (i32, i32, i32) {
    %c0_i32 = arith.constant 0 : i32
    %c0_i32_0 = arith.constant 0 : i32
    %c0_i32_1 = arith.constant 0 : i32
    return %arg0, %c0_i32, %c0_i32_0 : i32, i32, i32
  }
  func.func @transform_3(%arg0: i32) -> (i32, i32, i32) {
    %c0_i32 = arith.constant 0 : i32
    %c0_i32_0 = arith.constant 0 : i32
    %c0_i32_1 = arith.constant 0 : i32
    return %arg0, %c0_i32, %c0_i32_0 : i32, i32, i32
  }
  func.func @transform_4(%arg0: i32) -> (i32, i32, i32) {
    %c0_i32 = arith.constant 0 : i32
    %c0_i32_0 = arith.constant 0 : i32
    %c0_i32_1 = arith.constant 0 : i32
    return %arg0, %c0_i32, %c0_i32_0 : i32, i32, i32
  }
}

</mosaic_0001>

<bundles_post_ra>
// kernel: _multibox_loss_jit.1
= control target key start
LH: loop header
LB: loop body
LE: loop exit
PB: predicated region body
PF: predicated region fallthrough
CT: control target
= control target key end

     0   :  { %s1682_s15 = smov 0   ;;  %s2271_s0 = inlined_call_operand.vmem [shape: f32[2,4,256], index: 0, kind: input, shape index: {}]   ;;  %s2272_s1 = inlined_call_operand.vmem [shape: f32[2,21,256], index: 1, kind: input, shape index: {}]   ;;  %s2273_s2 = inlined_call_operand.vmem [shape: f32[2,4,256], index: 2, kind: input, shape index: {}]   ;;  %s2274_s3 = inlined_call_operand.vmem [shape: s32[2,1,256], index: 3, kind: input, shape index: {}]   ;;  %s2275_s4 = inlined_call_operand.vmem [shape: f32[2,1,128], index: 4, kind: output, shape index: {}]  }
   0x1 LB: > { %s1528_s16 = sadd.s32 4294967295, %s1652_s15   ;;  %p1532_p0 = scmp.ge.s32.totalorder %s1652_s15, 1  ;;  %s1652_s15 = sphi %s1682_s15, %s14_s15  }
   0x2   : > { %p191_p1 = scmp.lt.s32.totalorder %s1652_s15, 3 }
   0x4   : > { %p192_p2 = pnand %p1532_p0, %p191_p1 }
   0x5   : > { %p229_p3 = scmp.lt.s32.totalorder (!%p192_p2), %s1528_s16, 1  ;;  %v264_v0 = vlaneseq (!%p192_p2)  ;;  %vm274_vm1 = vcmask (!%p192_p2), 1040384   ;;  %v1654_v5 = vmov (!%p192_p2), 0.0   ;;  %vm323_vm2 = vcmask (!%p192_p2), 1044480  }
   0x6   : > { %195 = sbr.rel (%p192_p2) target bundleno = 7264 (0x1c60), region = 36  ;;  %vm310_vm14 = vcmask (!%p192_p2), 1043456  }
   0x7   : > { %v1693_v1 = vshrl.u32 (!%p192_p2), %v264_v0, 7 }
   0x9   : > { %v1707_v3 = vsub.s32 (!%p192_p2), 0, %v1693_v1  ;;  %v1710_v4 = vsub.s32 (!%p192_p2), 1, %v1693_v1  ;;  %v386_v48 = vadd.s32 (!%p192_p2), 8, %v1693_v1  ;;  %v387_v50 = vadd.s32 (!%p192_p2), 16, %v1693_v1 }
   0xd   : > { %s2277_s16 = smov (!%p229_p3, %s1528_s16), 1 }
   0xe   : > { %s1538_s17 = sshll.u32 %s2277_s16, 1  ;;  %s1545_s18 = smul.u32 48, %s2277_s16 }
   0xf   : > { %s247_s21 = scalar_lea.vmem %s2274_s3, %s1538_s17  ;;  %s1543_s25 = sshll.u32 %s2277_s16, 3 }
  0x10   : > { %v1700_v2 = vld [vmem:[%s247_s21] sm:$0x3]  ;;  %s238_s24 = scalar_lea.vmem %s2272_s1, %s1545_s18  ;;  %s233_s28 = scalar_lea.vmem %s2271_s0, %s1543_s25 }
  0x11   : > { %vm260_vm0 = vcmp.gt.s32.totalorder %v1700_v2, 0  ;;  %v1714_v7 = vld [vmem:[%s238_s24 + $0x20] sm:$0x1f]  ;;  %v1716_v8 = vld [vmem:[%s238_s24 + $0x28] sm:$0x1f]  ;;  %v254_v15 = vld [vmem:[%s238_s24 + $0x10] sm:$0xff]  ;;  %v391_v49 = vrot.slane %v1700_v2, %v1707_v3  ;;  %v395_v51 = vrot.slane %v1700_v2, %v1710_v4  ;;  %s243_s5 = scalar_lea.vmem %s2273_s2, %s1543_s25 }
  0x12   : > { %v1539_v6 = vsel %vm260_vm0, 1.0, %v1654_v5  ;;  %v252_v11 = vld [vmem:[%s238_s24] sm:$0xff]  ;;  %v253_v12 = vld [vmem:[%s238_s24 + $0x8] sm:$0xff]  ;;  %v255_v16 = vld [vmem:[%s238_s24 + $0x18] sm:$0xff]  ;;  %v324_v17 = vsel %vm323_vm2, %v1714_v7, -inf  ;;  %v333_v18 = vsel %vm323_vm2, %v1716_v8, -inf }
  0x13   : > { %v267_v9 = vrot.slane %v1539_v6, %v1707_v3  ;;  %v271_v10 = vrot.slane %v1539_v6, %v1710_v4  ;;  %v325_v20 = vmax.f32 %v252_v11, %v324_v17  ;;  %v334_v21 = vmax.f32 %v253_v12, %v333_v18 }
  0x14   : > { %vm396_vm3 = vcmp.eq.s32.totalorder %v1693_v1, %v391_v49  ;;  %vm398_vm4 = vcmp.eq.s32.totalorder %v386_v48, %v391_v49  ;;  %vm397_vm5 = vcmp.eq.s32.totalorder %v1693_v1, %v395_v51  ;;  %vm399_vm6 = vcmp.eq.s32.totalorder %v386_v48, %v395_v51 }
  0x15   : > { %v275_v13 = vsel %vm274_vm1, %v267_v9, 0.0  ;;  %v276_v14 = vsel %vm274_vm1, %v271_v10, 0.0  ;;  %v326_v22 = vmax.f32 %v325_v20, %v254_v15  ;;  %v335_v23 = vmax.f32 %v334_v21, %v255_v16 }
  0x16   : > { %v277_v19 = vadd.f32 %v276_v14, %v275_v13  ;;  %vm400_vm7 = vcmp.eq.s32.totalorder %v387_v50, %v391_v49  ;;  %vm401_vm8 = vcmp.eq.s32.totalorder %v387_v50, %v395_v51  ;;  %v402_v53 = vsel %vm396_vm3, %v252_v11, 0.0 }
  0x17   : > { %v327_v24 = vrot.slane %v326_v22, 4  ;;  %v336_v25 = vrot.slane %v335_v23, 4  ;;  %v404_v54 = vsel %vm398_vm4, %v254_v15, 0.0  ;;  %v403_v56 = vsel %vm397_vm5, %v253_v12, 0.0 }
  0x18   : > { %278 = vadd.xlane.f32.xlu0 %v277_v19  ;;  %v405_v57 = vsel %vm399_vm6, %v255_v16, 0.0  ;;  %v406_v58 = vsel %vm400_vm7, %v1714_v7, 0.0  ;;  %v407_v60 = vsel %vm401_vm8, %v1716_v8, 0.0  ;;  %v408_v63 = vadd.f32 %v404_v54, %v402_v53 }
  0x19   : > { %v328_v26 = vmax.f32 %v326_v22, %v327_v24  ;;  %v337_v27 = vmax.f32 %v335_v23, %v336_v25  ;;  %v409_v9 = vsel %vm323_vm2, %v406_v58, 0.0  ;;  %v417_v10 = vadd.f32 %v405_v57, %v403_v56 }
  0x1a   : > { %v418_v14 = vsel %vm323_vm2, %v407_v60, 0.0 }
  0x1b   : > { %v329_v28 = vrot.slane %v328_v26, 2  ;;  %v338_v29 = vrot.slane %v337_v27, 2 }
  0x1d   : > { %v330_v30 = vmax.f32 %v328_v26, %v329_v28  ;;  %v339_v31 = vmax.f32 %v337_v27, %v338_v29 }
  0x1f   : > { %v331_v32 = vrot.slane %v330_v30, 1  ;;  %v340_v33 = vrot.slane %v339_v31, 1 }
  0x21   : > { %v1726_v34 = vmax.f32 %v330_v30, %v331_v32  ;;  %v1728_v35 = vmax.f32 %v339_v31, %v340_v33 }
  0x23   : > { %v342_v36 = vsub.f32 %v252_v11, %v1726_v34  ;;  %v343_v37 = vsub.f32 %v253_v12, %v1728_v35  ;;  %v344_v38 = vsub.f32 %v254_v15, %v1726_v34  ;;  %v345_v39 = vsub.f32 %v255_v16, %v1728_v35 }
  0x24   : > { %v346_v40 = vsub.f32 %v1714_v7, %v1726_v34  ;;  %v347_v41 = vsub.f32 %v1716_v8, %v1728_v35  ;;  %v410_v16 = vadd.f32 %v409_v9, %v408_v63  ;;  %v419_v8 = vadd.f32 %v418_v14, %v417_v10 }
  0x25   : > { %v348_v42 = vmul.f32 1.442695, %v342_v36  ;;  %v350_v43 = vmul.f32 1.442695, %v343_v37  ;;  %v352_v44 = vmul.f32 1.442695, %v344_v38 }
  0x26   : > { %v354_v45 = vmul.f32 1.442695, %v345_v39  ;;  %v356_v46 = vmul.f32 1.442695, %v346_v40  ;;  %v358_v47 = vmul.f32 1.442695, %v347_v41 }
  0x27   : > { %1630 = vpow2.f32 %v348_v42  ;;  %v411_v21 = vrot.slane %v410_v16, 4  ;;  %v420_v23 = vrot.slane %v419_v8, 4  ;;  %v1655_v40 = vmov 1966171168  }
  0x28   : > { %1632 = vpow2.f32 %v350_v43  ;;  %v432_v41 = vunpack.c.l.s4 %v1655_v40  ;;  %v251_v43 = vld [vmem:[%s233_s28] sm:$0xff] }
  0x29   : > { %1634 = vpow2.f32 %v352_v44  ;;  %v412_v27 = vadd.f32 %v411_v21, %v410_v16  ;;  %v421_v29 = vadd.f32 %v420_v23, %v419_v8  ;;  %v258_v44 = vld [vmem:[%s243_s5] sm:$0xff] }
  0x2a   : > { %1636 = vpow2.f32 %v354_v45  ;;  %v288_v49 = vsub.f32 %v251_v43, %v258_v44  ;;  %v433_v50 = vunpack.c.0.s8 %v432_v41 }
  0x2b   : > { %1638 = vpow2.f32 %v356_v46  ;;  %v413_v33 = vrot.slane %v412_v27, 2  ;;  %v422_v36 = vrot.slane %v421_v29, 2 }
  0x2c   : > { %1640 = vpow2.f32 %v358_v47  ;;  %v289_v56 = vand.u32 2147483647, %v288_v49  ;;  %v291_v57 = vmul.f32 0.5, %v288_v49  ;;  %v1762_v58 = vsub.s32 %v433_v50, %v1693_v1 }
  0x2d   : > { %v414_v37 = vadd.f32 %v413_v33, %v412_v27  ;;  %v423_v38 = vadd.f32 %v422_v36, %v421_v29 }
  0x2e   : > { %vm290_vm9 = vcmp.lt.f32.partialorder %v289_v56, 1.0 }
  0x2f   : > { %v415_v39 = vrot.slane %v414_v37, 1  ;;  %v424_v42 = vrot.slane %v423_v38, 1 }
  0x31   : > { %v1631_v52 = vpop.eup %1630  ;;  %v416_v48 = vadd.f32 %v415_v39, %v414_v37 }
  0x32   : > { %v1633_v55 = vpop.eup %1632 }
  0x33   : > { %v1635_v59 = vpop.eup %1634 }
  0x34   : > { %v1637_v61 = vpop.eup %1636  ;;  %v360_v62 = vadd.f32 %v1635_v59, %v1631_v52  ;;  %v425_v52 = vadd.f32 %v424_v42, %v423_v38 }
  0x35   : > { %v1639_v5 = vpop.eup %1638  ;;  %v369_v6 = vadd.f32 %v1637_v61, %v1633_v55  ;;  %v292_v61 = vmul.f32 %v291_v57, %v288_v49 }
  0x36   : > { %v1641_v13 = vpop.eup %1640  ;;  %v361_v11 = vsel %vm323_vm2, %v1639_v5, 0.0  ;;  %v1656_v5 = vmov 0  }
  0x37   : > { %v362_v12 = vadd.f32 %v361_v11, %v360_v62  ;;  %v370_v15 = vsel %vm323_vm2, %v1641_v13, 0.0  ;;  %v1540_v62 = vadd.f32 -0.5, %v289_v56 }
  0x38   : > { %v371_v7 = vadd.f32 %v370_v15, %v369_v6  ;;  %v261_v6 = vsel %vm260_vm0, 1, %v1656_v5 }
  0x39   : > { %v363_v17 = vrot.slane %v362_v12, 4  ;;  %v298_v9 = vrot.slane %v261_v6, %v1707_v3  ;;  %v302_v1 = vrot.slane %v261_v6, %v1710_v4 }
  0x3a   : > { %v372_v18 = vrot.slane %v371_v7, 4 }
  0x3b   : > { %v364_v19 = vadd.f32 %v363_v17, %v362_v12  ;;  %vm303_vm12 = vcmp.eq.s32.totalorder %v298_v9, 1  ;;  %vm304_vm13 = vcmp.eq.s32.totalorder %v302_v1, 1 }
  0x3c   : > { %v373_v20 = vadd.f32 %v372_v18, %v371_v7 }
  0x3d   : > { %v365_v22 = vrot.slane %v364_v19, 2 }
  0x3e   : > { %v374_v24 = vrot.slane %v373_v20, 2 }
  0x3f   : > { %v366_v25 = vadd.f32 %v365_v22, %v364_v19 }
  0x40   : > { %v375_v26 = vadd.f32 %v374_v24, %v373_v20 }
  0x41   : > { %v367_v28 = vrot.slane %v366_v25, 1 }
  0x42   : > { %v376_v30 = vrot.slane %v375_v26, 1 }
  0x43   : > { %v368_v31 = vadd.f32 %v367_v28, %v366_v25 }
  0x44   : > { %v377_v32 = vadd.f32 %v376_v30, %v375_v26 }
  0x45   : > { %1642 = vlog2.f32 %v368_v31 }
  0x46   : > { %1644 = vlog2.f32 %v377_v32 }
  0x4f   : > { %v1643_v45 = vpop.eup %1642 }
  0x50   : > { %v1645_v46 = vpop.eup %1644  ;;  %v379_v47 = vmul.f32 0.6931472, %v1643_v45 }
  0x51   : > { %v381_v51 = vmul.f32 0.6931472, %v1645_v46 }
  0x52   : > { %v382_v53 = vadd.f32 %v379_v47, %v1726_v34 }
  0x53   : > { %v383_v54 = vadd.f32 %v381_v51, %v1728_v35  ;;  %v294_v35 = vsel %vm290_vm9, %v292_v61, %v1540_v62 }
  0x54   : > { %v426_v55 = vsub.f32 %v382_v53, %v416_v48  ;;  %v306_v14 = vcombine.high %v294_v35, %v294_v35  ;;  %v308_v8 = vsel %vm303_vm12, %v294_v35, 0.0 }
  0x55   : > { %v427_v59 = vsub.f32 %v383_v54, %v425_v52  ;;  %v311_v21 = vsel %vm310_vm14, %v308_v8, 0.0 }
  0x56   : > { %v309_v18 = vsel %vm304_vm13, %v306_v14, 0.0 }
  0x57   : > { %v430_v60 = vcombine.low %v426_v55, %v427_v59  ;;  %v312_v22 = vsel %vm310_vm14, %v309_v18, 0.0 }
  0x58   : > { %v313_v25 = vadd.f32 %v312_v22, %v311_v21 }
  0x59   : > { %v437_v63 = vrot.slane %v430_v60, %v1762_v58 }
  0x5b   : > { %v1769_v34 = vrot.slane %v437_v63, %v1762_v58 }
  0x5d   : > { %v446_v10 = vsel %vm260_vm0, 0.0, %v1769_v34 }
  0x5e   : > { %v1777_v13 = vrot.slane %v446_v10, %v1707_v3  ;;  %v1780_v11 = vrot.slane %v446_v10, %v1710_v4 }
  0x60   : > { %vm459_vm10 = vcmp.ge.s32.totalorder %v1777_v13, 1073741824  ;;  %vm460_vm11 = vcmp.ge.s32.totalorder %v1780_v11, 1073741824 }
  0x61   : > { %v461_v12 = vsel %vm459_vm10, 1, %v1656_v5  ;;  %v462_v15 = vsel %vm460_vm11, 1, %v1656_v5 }
  0x62   : > { %v463_v7 = vsel %vm274_vm1, %v461_v12, 0  ;;  %v464_v16 = vsel %vm274_vm1, %v462_v15, 0 }
  0x63   : > { %v465_v17 = vadd.s32 %v464_v16, %v463_v7 }
  0x65   : > { %v467_v19 = vshrl.u32 %v465_v17, 16  ;;  %v466_v20 = vand.u32 65535, %v465_v17 }
  0x67   : > { %v469_v23 = vcvt.s32.f32 %v467_v19  ;;  %v468_v24 = vcvt.s32.f32 %v466_v20 }
  0x69   : > { %472 = vadd.xlane.f32.xlu0 %v469_v23  ;;  %470 = vadd.xlane.f32.xlu1 %v468_v24 }
  0x6d   : > { %314 = vadd.xlane.f32.xlu1 %v313_v25 }
  0xa5   : > { %v279_v26 = vpop.xlane.xlu0 %278 }
  0xa6   : > { %v280_v27 = vrot.slane %v279_v26, 4 }
  0xa8   : > { %v281_v28 = vadd.f32 %v280_v27, %v279_v26 }
  0xaa   : > { %v282_v29 = vrot.slane %v281_v28, 2 }
  0xac   : > { %v283_v30 = vadd.f32 %v282_v29, %v281_v28 }
  0xae   : > { %v284_v31 = vrot.slane %v283_v30, 1 }
  0xb0   : > { %v285_v32 = vadd.f32 %v284_v31, %v283_v30 }
  0xb2   : > { %1546 = vpush %v285_v32 }
  0xe3   : > { %s1788_s6 = spop %1546 }
  0xe4   : > { %p1548_p4 = scmp.lt.s32.totalorder %s1788_s6, 0  ;;  %s1549_s7 = sceil.f32 %s1788_s6 }
  0xe5   : > { %s1550_s8 = sfloor.f32 %s1788_s6 }
  0xe6   : > { %s2279_s7 = smov (!%p1548_p4, %s1549_s7), %s1550_s8 }
  0xe7   : > { %s1552_s9 = scvt.f32.s32 %s2279_s7 }
  0xe9   : > { %s456_s10 = smul.u32 3, %s1552_s9 }
  0xeb   : > { %p457_p5 = scmp.lt.s32.totalorder %s456_s10, 256 }
  0xed   : > { %s2281_s10 = smov (!%p457_p5, %s456_s10), 256 }
  0xf6   : > { %v473_v33 = vpop.xlane.xlu0 %472  ;;  %v471_v36 = vpop.xlane.xlu1 %470 }
  0xf7   : > { %v475_v37 = vcvt.f32.s32 %v473_v33  ;;  %v474_v38 = vcvt.f32.s32 %v471_v36 }
  0xf9   : > { %v476_v39 = vshll.u32 %v475_v37, 16 }
  0xfa   : > { %v315_v40 = vpop.xlane.xlu1 %314 }
  0xfb   : > { %v477_v41 = vadd.s32 %v476_v39, %v474_v38  ;;  %v316_v42 = vrot.slane %v315_v40, 4 }
  0xfd   : > { %v478_v43 = vrot.slane %v477_v41, 4  ;;  %v317_v44 = vadd.f32 %v316_v42, %v315_v40 }
  0xff   : > { %v479_v45 = vadd.s32 %v478_v43, %v477_v41  ;;  %v318_v46 = vrot.slane %v317_v44, 2 }
 0x101   : > { %v319_v47 = vadd.f32 %v318_v46, %v317_v44  ;;  %v480_v48 = vrot.slane %v479_v45, 2 }
 0x103   : > { %v320_v49 = vrot.slane %v319_v47, 1  ;;  %v481_v50 = vadd.s32 %v480_v48, %v479_v45 }
 0x105   : > { %v321_v51 = vadd.f32 %v320_v49, %v319_v47  ;;  %v482_v52 = vrot.slane %v481_v50, 1 }
 0x107   : > { %1553 = vpush %v321_v51  ;;  %v483_v53 = vadd.s32 %v482_v52, %v481_v50 }
 0x109   : > { %1555 = vpush %v483_v53 }
 0x138   : > { %s1795_s11 = spop %1553 }
 0x13a   : > { %s1556_s12 = spop %1555 }
 0x13b   : > { %p485_p6 = scmp.ge.s32.totalorder %s1556_s12, %s2281_s10 }
 0x13d   : > { %s1798_s13 = scalar_select %p485_p6, 1073741824, 0 }
 0x13f   : > { %s487_s14 = sor.u32 536870912, %s1798_s13 }
 0x140   : > { %v488_v54 = vstv %s487_s14 }
 0x141   : > { %vm489_vm15 = vcmp.ge.s32.totalorder %v1777_v13, %v488_v54  ;;  %vm490_vm2 = vcmp.ge.s32.totalorder %v1780_v11, %v488_v54 }
 0x142   : > { %v491_v55 = vsel %vm489_vm15, 1, %v1656_v5  ;;  %v492_v56 = vsel %vm490_vm2, 1, %v1656_v5 }
 0x143   : > { %v493_v57 = vsel %vm274_vm1, %v491_v55, 0  ;;  %v494_v59 = vsel %vm274_vm1, %v492_v56, 0 }
 0x144   : > { %v495_v60 = vadd.s32 %v494_v59, %v493_v57 }
 0x146   : > { %v497_v61 = vshrl.u32 %v495_v60, 16  ;;  %v496_v62 = vand.u32 65535, %v495_v60 }
 0x148   : > { %v499_v63 = vcvt.s32.f32 %v497_v61  ;;  %v498_v6 = vcvt.s32.f32 %v496_v62 }
 0x14a   : > { %502 = vadd.xlane.f32.xlu0 %v499_v63  ;;  %500 = vadd.xlane.f32.xlu1 %v498_v6 }
 0x1d7   : > { %v503_v35 = vpop.xlane.xlu0 %502  ;;  %v501_v9 = vpop.xlane.xlu1 %500 }
 0x1d8   : > { %v505_v1 = vcvt.f32.s32 %v503_v35  ;;  %v504_v14 = vcvt.f32.s32 %v501_v9 }
 0x1da   : > { %v506_v10 = vshll.u32 %v505_v1, 16 }
 0x1dc   : > { %v507_v12 = vadd.s32 %v506_v10, %v504_v14 }
 0x1de   : > { %v508_v15 = vrot.slane %v507_v12, 4 }
 0x1e0   : > { %v509_v7 = vadd.s32 %v508_v15, %v507_v12 }
 0x1e2   : > { %v510_v16 = vrot.slane %v509_v7, 2 }
 0x1e4   : > { %v511_v17 = vadd.s32 %v510_v16, %v509_v7 }
 0x1e6   : > { %v512_v8 = vrot.slane %v511_v17, 1 }
 0x1e8   : > { %v513_v18 = vadd.s32 %v512_v8, %v511_v17 }
 0x1ea   : > { %1557 = vpush %v513_v18 }
 0x21b   : > { %s1558_s17 = spop %1557 }
 0x21c   : > { %p515_p7 = scmp.ge.s32.totalorder %s1558_s17, %s2281_s10 }
 0x21e   : > { %s2283_s14 = smov (!%p515_p7, %s487_s14), %s1798_s13 }
 0x21f   : > { %s517_s18 = sor.u32 268435456, %s2283_s14 }
 0x220   : > { %v518_v19 = vstv %s517_s18 }
 0x221   : > { %vm519_vm3 = vcmp.ge.s32.totalorder %v1777_v13, %v518_v19  ;;  %vm520_vm4 = vcmp.ge.s32.totalorder %v1780_v11, %v518_v19 }
 0x222   : > { %v521_v20 = vsel %vm519_vm3, 1, %v1656_v5  ;;  %v522_v21 = vsel %vm520_vm4, 1, %v1656_v5 }
 0x223   : > { %v523_v22 = vsel %vm274_vm1, %v521_v20, 0  ;;  %v524_v23 = vsel %vm274_vm1, %v522_v21, 0 }
 0x224   : > { %v525_v24 = vadd.s32 %v524_v23, %v523_v22 }
 0x226   : > { %v527_v25 = vshrl.u32 %v525_v24, 16  ;;  %v526_v26 = vand.u32 65535, %v525_v24 }
 0x228   : > { %v529_v27 = vcvt.s32.f32 %v527_v25  ;;  %v528_v28 = vcvt.s32.f32 %v526_v26 }
 0x22a   : > { %532 = vadd.xlane.f32.xlu0 %v529_v27  ;;  %530 = vadd.xlane.f32.xlu1 %v528_v28 }
 0x2b7   : > { %v533_v29 = vpop.xlane.xlu0 %532  ;;  %v531_v30 = vpop.xlane.xlu1 %530 }
 0x2b8   : > { %v535_v31 = vcvt.f32.s32 %v533_v29  ;;  %v534_v33 = vcvt.f32.s32 %v531_v30 }
 0x2ba   : > { %v536_v32 = vshll.u32 %v535_v31, 16 }
 0x2bc   : > { %v537_v36 = vadd.s32 %v536_v32, %v534_v33 }
 0x2be   : > { %v538_v37 = vrot.slane %v537_v36, 4 }
 0x2c0   : > { %v539_v38 = vadd.s32 %v538_v37, %v537_v36 }
 0x2c2   : > { %v540_v39 = vrot.slane %v539_v38, 2 }
 0x2c4   : > { %v541_v40 = vadd.s32 %v540_v39, %v539_v38 }
 0x2c6   : > { %v542_v41 = vrot.slane %v541_v40, 1 }
 0x2c8   : > { %v543_v42 = vadd.s32 %v542_v41, %v541_v40 }
 0x2ca   : > { %1559 = vpush %v543_v42 }
 0x2fb   : > { %s1560_s19 = spop %1559 }
 0x2fc   : > { %p545_p8 = scmp.ge.s32.totalorder %s1560_s19, %s2281_s10 }
 0x2fe   : > { %s2285_s18 = smov (!%p545_p8, %s517_s18), %s2283_s14 }
 0x2ff   : > { %s547_s20 = sor.u32 134217728, %s2285_s18 }
 0x300   : > { %v548_v43 = vstv %s547_s20 }
 0x301   : > { %vm549_vm5 = vcmp.ge.s32.totalorder %v1777_v13, %v548_v43  ;;  %vm550_vm6 = vcmp.ge.s32.totalorder %v1780_v11, %v548_v43 }
 0x302   : > { %v551_v44 = vsel %vm549_vm5, 1, %v1656_v5  ;;  %v552_v45 = vsel %vm550_vm6, 1, %v1656_v5 }
 0x303   : > { %v553_v46 = vsel %vm274_vm1, %v551_v44, 0  ;;  %v554_v47 = vsel %vm274_vm1, %v552_v45, 0 }
 0x304   : > { %v555_v48 = vadd.s32 %v554_v47, %v553_v46 }
 0x306   : > { %v557_v49 = vshrl.u32 %v555_v48, 16  ;;  %v556_v50 = vand.u32 65535, %v555_v48 }
 0x308   : > { %v559_v51 = vcvt.s32.f32 %v557_v49  ;;  %v558_v52 = vcvt.s32.f32 %v556_v50 }
 0x30a   : > { %562 = vadd.xlane.f32.xlu0 %v559_v51  ;;  %560 = vadd.xlane.f32.xlu1 %v558_v52 }
 0x397   : > { %v563_v53 = vpop.xlane.xlu0 %562  ;;  %v561_v54 = vpop.xlane.xlu1 %560 }
 0x398   : > { %v565_v55 = vcvt.f32.s32 %v563_v53  ;;  %v564_v57 = vcvt.f32.s32 %v561_v54 }
 0x39a   : > { %v566_v56 = vshll.u32 %v565_v55, 16 }
 0x39c   : > { %v567_v59 = vadd.s32 %v566_v56, %v564_v57 }
 0x39e   : > { %v568_v60 = vrot.slane %v567_v59, 4 }
 0x3a0   : > { %v569_v61 = vadd.s32 %v568_v60, %v567_v59 }
 0x3a2   : > { %v570_v62 = vrot.slane %v569_v61, 2 }
 0x3a4   : > { %v571_v63 = vadd.s32 %v570_v62, %v569_v61 }
 0x3a6   : > { %v572_v6 = vrot.slane %v571_v63, 1 }
 0x3a8   : > { %v573_v35 = vadd.s32 %v572_v6, %v571_v63 }
 0x3aa   : > { %1561 = vpush %v573_v35 }
 0x3db   : > { %s1562_s21 = spop %1561 }
 0x3dc   : > { %p575_p9 = scmp.ge.s32.totalorder %s1562_s21, %s2281_s10 }
 0x3de   : > { %s2287_s20 = smov (!%p575_p9, %s547_s20), %s2285_s18 }
 0x3df   : > { %s577_s22 = sor.u32 67108864, %s2287_s20 }
 0x3e0   : > { %v578_v9 = vstv %s577_s22 }
 0x3e1   : > { %vm579_vm7 = vcmp.ge.s32.totalorder %v1777_v13, %v578_v9  ;;  %vm580_vm8 = vcmp.ge.s32.totalorder %v1780_v11, %v578_v9 }
 0x3e2   : > { %v581_v1 = vsel %vm579_vm7, 1, %v1656_v5  ;;  %v582_v10 = vsel %vm580_vm8, 1, %v1656_v5 }
 0x3e3   : > { %v583_v14 = vsel %vm274_vm1, %v581_v1, 0  ;;  %v584_v12 = vsel %vm274_vm1, %v582_v10, 0 }
 0x3e4   : > { %v585_v15 = vadd.s32 %v584_v12, %v583_v14 }
 0x3e6   : > { %v587_v7 = vshrl.u32 %v585_v15, 16  ;;  %v586_v16 = vand.u32 65535, %v585_v15 }
 0x3e8   : > { %v589_v17 = vcvt.s32.f32 %v587_v7  ;;  %v588_v8 = vcvt.s32.f32 %v586_v16 }
 0x3ea   : > { %592 = vadd.xlane.f32.xlu0 %v589_v17  ;;  %590 = vadd.xlane.f32.xlu1 %v588_v8 }
 0x477   : > { %v593_v18 = vpop.xlane.xlu0 %592  ;;  %v591_v19 = vpop.xlane.xlu1 %590 }
 0x478   : > { %v595_v20 = vcvt.f32.s32 %v593_v18  ;;  %v594_v22 = vcvt.f32.s32 %v591_v19 }
 0x47a   : > { %v596_v21 = vshll.u32 %v595_v20, 16 }
 0x47c   : > { %v597_v23 = vadd.s32 %v596_v21, %v594_v22 }
 0x47e   : > { %v598_v24 = vrot.slane %v597_v23, 4 }
 0x480   : > { %v599_v25 = vadd.s32 %v598_v24, %v597_v23 }
 0x482   : > { %v600_v26 = vrot.slane %v599_v25, 2 }
 0x484   : > { %v601_v27 = vadd.s32 %v600_v26, %v599_v25 }
 0x486   : > { %v602_v28 = vrot.slane %v601_v27, 1 }
 0x488   : > { %v603_v29 = vadd.s32 %v602_v28, %v601_v27 }
 0x48a   : > { %1563 = vpush %v603_v29 }
 0x4bb   : > { %s1564_s23 = spop %1563 }
 0x4bc   : > { %p605_p10 = scmp.ge.s32.totalorder %s1564_s23, %s2281_s10 }
 0x4be   : > { %s2289_s22 = smov (!%p605_p10, %s577_s22), %s2287_s20 }
 0x4bf   : > { %s607_s24 = sor.u32 33554432, %s2289_s22 }
 0x4c0   : > { %v608_v30 = vstv %s607_s24 }
 0x4c1   : > { %vm609_vm9 = vcmp.ge.s32.totalorder %v1777_v13, %v608_v30  ;;  %vm610_vm10 = vcmp.ge.s32.totalorder %v1780_v11, %v608_v30 }
 0x4c2   : > { %v611_v31 = vsel %vm609_vm9, 1, %v1656_v5  ;;  %v612_v32 = vsel %vm610_vm10, 1, %v1656_v5 }
 0x4c3   : > { %v613_v33 = vsel %vm274_vm1, %v611_v31, 0  ;;  %v614_v36 = vsel %vm274_vm1, %v612_v32, 0 }
 0x4c4   : > { %v615_v37 = vadd.s32 %v614_v36, %v613_v33 }
 0x4c6   : > { %v617_v38 = vshrl.u32 %v615_v37, 16  ;;  %v616_v39 = vand.u32 65535, %v615_v37 }
 0x4c8   : > { %v619_v40 = vcvt.s32.f32 %v617_v38  ;;  %v618_v41 = vcvt.s32.f32 %v616_v39 }
 0x4ca   : > { %622 = vadd.xlane.f32.xlu0 %v619_v40  ;;  %620 = vadd.xlane.f32.xlu1 %v618_v41 }
 0x557   : > { %v623_v42 = vpop.xlane.xlu0 %622  ;;  %v621_v43 = vpop.xlane.xlu1 %620 }
 0x558   : > { %v625_v44 = vcvt.f32.s32 %v623_v42  ;;  %v624_v46 = vcvt.f32.s32 %v621_v43 }
 0x55a   : > { %v626_v45 = vshll.u32 %v625_v44, 16 }
 0x55c   : > { %v627_v47 = vadd.s32 %v626_v45, %v624_v46 }
 0x55e   : > { %v628_v48 = vrot.slane %v627_v47, 4 }
 0x560   : > { %v629_v49 = vadd.s32 %v628_v48, %v627_v47 }
 0x562   : > { %v630_v50 = vrot.slane %v629_v49, 2 }
 0x564   : > { %v631_v51 = vadd.s32 %v630_v50, %v629_v49 }
 0x566   : > { %v632_v52 = vrot.slane %v631_v51, 1 }
 0x568   : > { %v633_v53 = vadd.s32 %v632_v52, %v631_v51 }
 0x56a   : > { %1565 = vpush %v633_v53 }
 0x59b   : > { %s1566_s25 = spop %1565 }
 0x59c   : > { %p635_p11 = scmp.ge.s32.totalorder %s1566_s25, %s2281_s10 }
 0x59e   : > { %s2291_s24 = smov (!%p635_p11, %s607_s24), %s2289_s22 }
 0x59f   : > { %s637_s26 = sor.u32 16777216, %s2291_s24 }
 0x5a0   : > { %v638_v54 = vstv %s637_s26 }
 0x5a1   : > { %vm639_vm11 = vcmp.ge.s32.totalorder %v1777_v13, %v638_v54  ;;  %vm640_vm12 = vcmp.ge.s32.totalorder %v1780_v11, %v638_v54 }
 0x5a2   : > { %v641_v55 = vsel %vm639_vm11, 1, %v1656_v5  ;;  %v642_v56 = vsel %vm640_vm12, 1, %v1656_v5 }
 0x5a3   : > { %v643_v57 = vsel %vm274_vm1, %v641_v55, 0  ;;  %v644_v59 = vsel %vm274_vm1, %v642_v56, 0 }
 0x5a4   : > { %v645_v60 = vadd.s32 %v644_v59, %v643_v57 }
 0x5a6   : > { %v647_v61 = vshrl.u32 %v645_v60, 16  ;;  %v646_v62 = vand.u32 65535, %v645_v60 }
 0x5a8   : > { %v649_v63 = vcvt.s32.f32 %v647_v61  ;;  %v648_v6 = vcvt.s32.f32 %v646_v62 }
 0x5aa   : > { %652 = vadd.xlane.f32.xlu0 %v649_v63  ;;  %650 = vadd.xlane.f32.xlu1 %v648_v6 }
 0x637   : > { %v653_v35 = vpop.xlane.xlu0 %652  ;;  %v651_v9 = vpop.xlane.xlu1 %650 }
 0x638   : > { %v655_v1 = vcvt.f32.s32 %v653_v35  ;;  %v654_v14 = vcvt.f32.s32 %v651_v9 }
 0x63a   : > { %v656_v10 = vshll.u32 %v655_v1, 16 }
 0x63c   : > { %v657_v12 = vadd.s32 %v656_v10, %v654_v14 }
 0x63e   : > { %v658_v15 = vrot.slane %v657_v12, 4 }
 0x640   : > { %v659_v7 = vadd.s32 %v658_v15, %v657_v12 }
 0x642   : > { %v660_v16 = vrot.slane %v659_v7, 2 }
 0x644   : > { %v661_v17 = vadd.s32 %v660_v16, %v659_v7 }
 0x646   : > { %v662_v8 = vrot.slane %v661_v17, 1 }
 0x648   : > { %v663_v18 = vadd.s32 %v662_v8, %v661_v17 }
 0x64a   : > { %1567 = vpush %v663_v18 }
 0x67b   : > { %s1568_s27 = spop %1567 }
 0x67c   : > { %p665_p12 = scmp.ge.s32.totalorder %s1568_s27, %s2281_s10 }
 0x67e   : > { %s2293_s26 = smov (!%p665_p12, %s637_s26), %s2291_s24 }
 0x67f   : > { %s667_s28 = sor.u32 8388608, %s2293_s26 }
 0x680   : > { %v668_v19 = vstv %s667_s28 }
 0x681   : > { %vm669_vm13 = vcmp.ge.s32.totalorder %v1777_v13, %v668_v19  ;;  %vm670_vm14 = vcmp.ge.s32.totalorder %v1780_v11, %v668_v19 }
 0x682   : > { %v671_v20 = vsel %vm669_vm13, 1, %v1656_v5  ;;  %v672_v21 = vsel %vm670_vm14, 1, %v1656_v5 }
 0x683   : > { %v673_v22 = vsel %vm274_vm1, %v671_v20, 0  ;;  %v674_v23 = vsel %vm274_vm1, %v672_v21, 0 }
 0x684   : > { %v675_v24 = vadd.s32 %v674_v23, %v673_v22 }
 0x686   : > { %v677_v25 = vshrl.u32 %v675_v24, 16  ;;  %v676_v26 = vand.u32 65535, %v675_v24 }
 0x688   : > { %v679_v27 = vcvt.s32.f32 %v677_v25  ;;  %v678_v28 = vcvt.s32.f32 %v676_v26 }
 0x68a   : > { %682 = vadd.xlane.f32.xlu0 %v679_v27  ;;  %680 = vadd.xlane.f32.xlu1 %v678_v28 }
 0x717   : > { %v683_v29 = vpop.xlane.xlu0 %682  ;;  %v681_v30 = vpop.xlane.xlu1 %680 }
 0x718   : > { %v685_v31 = vcvt.f32.s32 %v683_v29  ;;  %v684_v33 = vcvt.f32.s32 %v681_v30 }
 0x71a   : > { %v686_v32 = vshll.u32 %v685_v31, 16 }
 0x71c   : > { %v687_v36 = vadd.s32 %v686_v32, %v684_v33 }
 0x71e   : > { %v688_v37 = vrot.slane %v687_v36, 4 }
 0x720   : > { %v689_v38 = vadd.s32 %v688_v37, %v687_v36 }
 0x722   : > { %v690_v39 = vrot.slane %v689_v38, 2 }
 0x724   : > { %v691_v40 = vadd.s32 %v690_v39, %v689_v38 }
 0x726   : > { %v692_v41 = vrot.slane %v691_v40, 1 }
 0x728   : > { %v693_v42 = vadd.s32 %v692_v41, %v691_v40 }
 0x72a   : > { %1569 = vpush %v693_v42 }
 0x75b   : > { %s1570_s29 = spop %1569 }
 0x75c   : > { %p695_p13 = scmp.ge.s32.totalorder %s1570_s29, %s2281_s10 }
 0x75e   : > { %s2295_s28 = smov (!%p695_p13, %s667_s28), %s2293_s26 }
 0x75f   : > { %s697_s30 = sor.u32 4194304, %s2295_s28 }
 0x760   : > { %v698_v43 = vstv %s697_s30 }
 0x761   : > { %vm699_vm15 = vcmp.ge.s32.totalorder %v1777_v13, %v698_v43  ;;  %vm700_vm2 = vcmp.ge.s32.totalorder %v1780_v11, %v698_v43 }
 0x762   : > { %v701_v44 = vsel %vm699_vm15, 1, %v1656_v5  ;;  %v702_v45 = vsel %vm700_vm2, 1, %v1656_v5 }
 0x763   : > { %v703_v46 = vsel %vm274_vm1, %v701_v44, 0  ;;  %v704_v47 = vsel %vm274_vm1, %v702_v45, 0 }
 0x764   : > { %v705_v48 = vadd.s32 %v704_v47, %v703_v46 }
 0x766   : > { %v707_v49 = vshrl.u32 %v705_v48, 16  ;;  %v706_v50 = vand.u32 65535, %v705_v48 }
 0x768   : > { %v709_v51 = vcvt.s32.f32 %v707_v49  ;;  %v708_v52 = vcvt.s32.f32 %v706_v50 }
 0x76a   : > { %712 = vadd.xlane.f32.xlu0 %v709_v51  ;;  %710 = vadd.xlane.f32.xlu1 %v708_v52 }
 0x7f7   : > { %v713_v53 = vpop.xlane.xlu0 %712  ;;  %v711_v54 = vpop.xlane.xlu1 %710 }
 0x7f8   : > { %v715_v55 = vcvt.f32.s32 %v713_v53  ;;  %v714_v57 = vcvt.f32.s32 %v711_v54 }
 0x7fa   : > { %v716_v56 = vshll.u32 %v715_v55, 16 }
 0x7fc   : > { %v717_v59 = vadd.s32 %v716_v56, %v714_v57 }
 0x7fe   : > { %v718_v60 = vrot.slane %v717_v59, 4 }
 0x800   : > { %v719_v61 = vadd.s32 %v718_v60, %v717_v59 }
 0x802   : > { %v720_v62 = vrot.slane %v719_v61, 2 }
 0x804   : > { %v721_v63 = vadd.s32 %v720_v62, %v719_v61 }
 0x806   : > { %v722_v6 = vrot.slane %v721_v63, 1 }
 0x808   : > { %v723_v35 = vadd.s32 %v722_v6, %v721_v63 }
 0x80a   : > { %1571 = vpush %v723_v35 }
 0x83b   : > { %s1572_s5 = spop %1571 }
 0x83c   : > { %p725_p0 = scmp.ge.s32.totalorder %s1572_s5, %s2281_s10 }
 0x83e   : > { %s2297_s30 = smov (!%p725_p0, %s697_s30), %s2295_s28 }
 0x83f   : > { %s727_s7 = sor.u32 2097152, %s2297_s30 }
 0x840   : > { %v728_v9 = vstv %s727_s7 }
 0x841   : > { %vm729_vm3 = vcmp.ge.s32.totalorder %v1777_v13, %v728_v9  ;;  %vm730_vm4 = vcmp.ge.s32.totalorder %v1780_v11, %v728_v9 }
 0x842   : > { %v731_v1 = vsel %vm729_vm3, 1, %v1656_v5  ;;  %v732_v10 = vsel %vm730_vm4, 1, %v1656_v5 }
 0x843   : > { %v733_v14 = vsel %vm274_vm1, %v731_v1, 0  ;;  %v734_v12 = vsel %vm274_vm1, %v732_v10, 0 }
 0x844   : > { %v735_v15 = vadd.s32 %v734_v12, %v733_v14 }
 0x846   : > { %v737_v7 = vshrl.u32 %v735_v15, 16  ;;  %v736_v16 = vand.u32 65535, %v735_v15 }
 0x848   : > { %v739_v17 = vcvt.s32.f32 %v737_v7  ;;  %v738_v8 = vcvt.s32.f32 %v736_v16 }
 0x84a   : > { %742 = vadd.xlane.f32.xlu0 %v739_v17  ;;  %740 = vadd.xlane.f32.xlu1 %v738_v8 }
 0x8d7   : > { %v743_v18 = vpop.xlane.xlu0 %742  ;;  %v741_v19 = vpop.xlane.xlu1 %740 }
 0x8d8   : > { %v745_v20 = vcvt.f32.s32 %v743_v18  ;;  %v744_v22 = vcvt.f32.s32 %v741_v19 }
 0x8da   : > { %v746_v21 = vshll.u32 %v745_v20, 16 }
 0x8dc   : > { %v747_v23 = vadd.s32 %v746_v21, %v744_v22 }
 0x8de   : > { %v748_v24 = vrot.slane %v747_v23, 4 }
 0x8e0   : > { %v749_v25 = vadd.s32 %v748_v24, %v747_v23 }
 0x8e2   : > { %v750_v26 = vrot.slane %v749_v25, 2 }
 0x8e4   : > { %v751_v27 = vadd.s32 %v750_v26, %v749_v25 }
 0x8e6   : > { %v752_v28 = vrot.slane %v751_v27, 1 }
 0x8e8   : > { %v753_v29 = vadd.s32 %v752_v28, %v751_v27 }
 0x8ea   : > { %1573 = vpush %v753_v29 }
 0x91b   : > { %s1574_s8 = spop %1573 }
 0x91c   : > { %p755_p1 = scmp.ge.s32.totalorder %s1574_s8, %s2281_s10 }
 0x91e   : > { %s2299_s7 = smov (!%p755_p1, %s727_s7), %s2297_s30 }
 0x91f   : > { %s757_s9 = sor.u32 1048576, %s2299_s7 }
 0x920   : > { %v758_v30 = vstv %s757_s9 }
 0x921   : > { %vm759_vm5 = vcmp.ge.s32.totalorder %v1777_v13, %v758_v30  ;;  %vm760_vm6 = vcmp.ge.s32.totalorder %v1780_v11, %v758_v30 }
 0x922   : > { %v761_v31 = vsel %vm759_vm5, 1, %v1656_v5  ;;  %v762_v32 = vsel %vm760_vm6, 1, %v1656_v5 }
 0x923   : > { %v763_v33 = vsel %vm274_vm1, %v761_v31, 0  ;;  %v764_v36 = vsel %vm274_vm1, %v762_v32, 0 }
 0x924   : > { %v765_v37 = vadd.s32 %v764_v36, %v763_v33 }
 0x926   : > { %v767_v38 = vshrl.u32 %v765_v37, 16  ;;  %v766_v39 = vand.u32 65535, %v765_v37 }
 0x928   : > { %v769_v40 = vcvt.s32.f32 %v767_v38  ;;  %v768_v41 = vcvt.s32.f32 %v766_v39 }
 0x92a   : > { %772 = vadd.xlane.f32.xlu0 %v769_v40  ;;  %770 = vadd.xlane.f32.xlu1 %v768_v41 }
 0x9b7   : > { %v773_v42 = vpop.xlane.xlu0 %772  ;;  %v771_v43 = vpop.xlane.xlu1 %770 }
 0x9b8   : > { %v775_v44 = vcvt.f32.s32 %v773_v42  ;;  %v774_v46 = vcvt.f32.s32 %v771_v43 }
 0x9ba   : > { %v776_v45 = vshll.u32 %v775_v44, 16 }
 0x9bc   : > { %v777_v47 = vadd.s32 %v776_v45, %v774_v46 }
 0x9be   : > { %v778_v48 = vrot.slane %v777_v47, 4 }
 0x9c0   : > { %v779_v49 = vadd.s32 %v778_v48, %v777_v47 }
 0x9c2   : > { %v780_v50 = vrot.slane %v779_v49, 2 }
 0x9c4   : > { %v781_v51 = vadd.s32 %v780_v50, %v779_v49 }
 0x9c6   : > { %v782_v52 = vrot.slane %v781_v51, 1 }
 0x9c8   : > { %v783_v53 = vadd.s32 %v782_v52, %v781_v51 }
 0x9ca   : > { %1575 = vpush %v783_v53 }
 0x9fb   : > { %s1576_s12 = spop %1575 }
 0x9fc   : > { %p785_p2 = scmp.ge.s32.totalorder %s1576_s12, %s2281_s10 }
 0x9fe   : > { %s2301_s9 = smov (!%p785_p2, %s757_s9), %s2299_s7 }
 0x9ff   : > { %s787_s13 = sor.u32 524288, %s2301_s9 }
 0xa00   : > { %v788_v54 = vstv %s787_s13 }
 0xa01   : > { %vm789_vm7 = vcmp.ge.s32.totalorder %v1777_v13, %v788_v54  ;;  %vm790_vm8 = vcmp.ge.s32.totalorder %v1780_v11, %v788_v54 }
 0xa02   : > { %v791_v55 = vsel %vm789_vm7, 1, %v1656_v5  ;;  %v792_v56 = vsel %vm790_vm8, 1, %v1656_v5 }
 0xa03   : > { %v793_v57 = vsel %vm274_vm1, %v791_v55, 0  ;;  %v794_v59 = vsel %vm274_vm1, %v792_v56, 0 }
 0xa04   : > { %v795_v60 = vadd.s32 %v794_v59, %v793_v57 }
 0xa06   : > { %v797_v61 = vshrl.u32 %v795_v60, 16  ;;  %v796_v62 = vand.u32 65535, %v795_v60 }
 0xa08   : > { %v799_v63 = vcvt.s32.f32 %v797_v61  ;;  %v798_v6 = vcvt.s32.f32 %v796_v62 }
 0xa0a   : > { %802 = vadd.xlane.f32.xlu0 %v799_v63  ;;  %800 = vadd.xlane.f32.xlu1 %v798_v6 }
 0xa97   : > { %v803_v35 = vpop.xlane.xlu0 %802  ;;  %v801_v9 = vpop.xlane.xlu1 %800 }
 0xa98   : > { %v805_v1 = vcvt.f32.s32 %v803_v35  ;;  %v804_v14 = vcvt.f32.s32 %v801_v9 }
 0xa9a   : > { %v806_v10 = vshll.u32 %v805_v1, 16 }
 0xa9c   : > { %v807_v12 = vadd.s32 %v806_v10, %v804_v14 }
 0xa9e   : > { %v808_v15 = vrot.slane %v807_v12, 4 }
 0xaa0   : > { %v809_v7 = vadd.s32 %v808_v15, %v807_v12 }
 0xaa2   : > { %v810_v16 = vrot.slane %v809_v7, 2 }
 0xaa4   : > { %v811_v17 = vadd.s32 %v810_v16, %v809_v7 }
 0xaa6   : > { %v812_v8 = vrot.slane %v811_v17, 1 }
 0xaa8   : > { %v813_v18 = vadd.s32 %v812_v8, %v811_v17 }
 0xaaa   : > { %1577 = vpush %v813_v18 }
 0xadb   : > { %s1578_s14 = spop %1577 }
 0xadc   : > { %p815_p3 = scmp.ge.s32.totalorder %s1578_s14, %s2281_s10 }
 0xade   : > { %s2303_s13 = smov (!%p815_p3, %s787_s13), %s2301_s9 }
 0xadf   : > { %s817_s17 = sor.u32 262144, %s2303_s13 }
 0xae0   : > { %v818_v19 = vstv %s817_s17 }
 0xae1   : > { %vm819_vm9 = vcmp.ge.s32.totalorder %v1777_v13, %v818_v19  ;;  %vm820_vm10 = vcmp.ge.s32.totalorder %v1780_v11, %v818_v19 }
 0xae2   : > { %v821_v20 = vsel %vm819_vm9, 1, %v1656_v5  ;;  %v822_v21 = vsel %vm820_vm10, 1, %v1656_v5 }
 0xae3   : > { %v823_v22 = vsel %vm274_vm1, %v821_v20, 0  ;;  %v824_v23 = vsel %vm274_vm1, %v822_v21, 0 }
 0xae4   : > { %v825_v24 = vadd.s32 %v824_v23, %v823_v22 }
 0xae6   : > { %v827_v25 = vshrl.u32 %v825_v24, 16  ;;  %v826_v26 = vand.u32 65535, %v825_v24 }
 0xae8   : > { %v829_v27 = vcvt.s32.f32 %v827_v25  ;;  %v828_v28 = vcvt.s32.f32 %v826_v26 }
 0xaea   : > { %832 = vadd.xlane.f32.xlu0 %v829_v27  ;;  %830 = vadd.xlane.f32.xlu1 %v828_v28 }
 0xb77   : > { %v833_v29 = vpop.xlane.xlu0 %832  ;;  %v831_v30 = vpop.xlane.xlu1 %830 }
 0xb78   : > { %v835_v31 = vcvt.f32.s32 %v833_v29  ;;  %v834_v33 = vcvt.f32.s32 %v831_v30 }
 0xb7a   : > { %v836_v32 = vshll.u32 %v835_v31, 16 }
 0xb7c   : > { %v837_v36 = vadd.s32 %v836_v32, %v834_v33 }
 0xb7e   : > { %v838_v37 = vrot.slane %v837_v36, 4 }
 0xb80   : > { %v839_v38 = vadd.s32 %v838_v37, %v837_v36 }
 0xb82   : > { %v840_v39 = vrot.slane %v839_v38, 2 }
 0xb84   : > { %v841_v40 = vadd.s32 %v840_v39, %v839_v38 }
 0xb86   : > { %v842_v41 = vrot.slane %v841_v40, 1 }
 0xb88   : > { %v843_v42 = vadd.s32 %v842_v41, %v841_v40 }
 0xb8a   : > { %1579 = vpush %v843_v42 }
 0xbbb   : > { %s1580_s18 = spop %1579 }
 0xbbc   : > { %p845_p4 = scmp.ge.s32.totalorder %s1580_s18, %s2281_s10 }
 0xbbe   : > { %s2305_s17 = smov (!%p845_p4, %s817_s17), %s2303_s13 }
 0xbbf   : > { %s847_s19 = sor.u32 131072, %s2305_s17 }
 0xbc0   : > { %v848_v43 = vstv %s847_s19 }
 0xbc1   : > { %vm849_vm11 = vcmp.ge.s32.totalorder %v1777_v13, %v848_v43  ;;  %vm850_vm12 = vcmp.ge.s32.totalorder %v1780_v11, %v848_v43 }
 0xbc2   : > { %v851_v44 = vsel %vm849_vm11, 1, %v1656_v5  ;;  %v852_v45 = vsel %vm850_vm12, 1, %v1656_v5 }
 0xbc3   : > { %v853_v46 = vsel %vm274_vm1, %v851_v44, 0  ;;  %v854_v47 = vsel %vm274_vm1, %v852_v45, 0 }
 0xbc4   : > { %v855_v48 = vadd.s32 %v854_v47, %v853_v46 }
 0xbc6   : > { %v857_v49 = vshrl.u32 %v855_v48, 16  ;;  %v856_v50 = vand.u32 65535, %v855_v48 }
 0xbc8   : > { %v859_v51 = vcvt.s32.f32 %v857_v49  ;;  %v858_v52 = vcvt.s32.f32 %v856_v50 }
 0xbca   : > { %862 = vadd.xlane.f32.xlu0 %v859_v51  ;;  %860 = vadd.xlane.f32.xlu1 %v858_v52 }
 0xc57   : > { %v863_v53 = vpop.xlane.xlu0 %862  ;;  %v861_v54 = vpop.xlane.xlu1 %860 }
 0xc58   : > { %v865_v55 = vcvt.f32.s32 %v863_v53  ;;  %v864_v57 = vcvt.f32.s32 %v861_v54 }
 0xc5a   : > { %v866_v56 = vshll.u32 %v865_v55, 16 }
 0xc5c   : > { %v867_v59 = vadd.s32 %v866_v56, %v864_v57 }
 0xc5e   : > { %v868_v60 = vrot.slane %v867_v59, 4 }
 0xc60   : > { %v869_v61 = vadd.s32 %v868_v60, %v867_v59 }
 0xc62   : > { %v870_v62 = vrot.slane %v869_v61, 2 }
 0xc64   : > { %v871_v63 = vadd.s32 %v870_v62, %v869_v61 }
 0xc66   : > { %v872_v6 = vrot.slane %v871_v63, 1 }
 0xc68   : > { %v873_v35 = vadd.s32 %v872_v6, %v871_v63 }
 0xc6a   : > { %1581 = vpush %v873_v35 }
 0xc9b   : > { %s1582_s20 = spop %1581 }
 0xc9c   : > { %p875_p5 = scmp.ge.s32.totalorder %s1582_s20, %s2281_s10 }
 0xc9e   : > { %s2307_s19 = smov (!%p875_p5, %s847_s19), %s2305_s17 }
 0xc9f   : > { %s877_s21 = sor.u32 65536, %s2307_s19 }
 0xca0   : > { %v878_v9 = vstv %s877_s21 }
 0xca1   : > { %vm879_vm13 = vcmp.ge.s32.totalorder %v1777_v13, %v878_v9  ;;  %vm880_vm14 = vcmp.ge.s32.totalorder %v1780_v11, %v878_v9 }
 0xca2   : > { %v881_v1 = vsel %vm879_vm13, 1, %v1656_v5  ;;  %v882_v10 = vsel %vm880_vm14, 1, %v1656_v5 }
 0xca3   : > { %v883_v14 = vsel %vm274_vm1, %v881_v1, 0  ;;  %v884_v12 = vsel %vm274_vm1, %v882_v10, 0 }
 0xca4   : > { %v885_v15 = vadd.s32 %v884_v12, %v883_v14 }
 0xca6   : > { %v887_v7 = vshrl.u32 %v885_v15, 16  ;;  %v886_v16 = vand.u32 65535, %v885_v15 }
 0xca8   : > { %v889_v17 = vcvt.s32.f32 %v887_v7  ;;  %v888_v8 = vcvt.s32.f32 %v886_v16 }
 0xcaa   : > { %892 = vadd.xlane.f32.xlu0 %v889_v17  ;;  %890 = vadd.xlane.f32.xlu1 %v888_v8 }
 0xd37   : > { %v893_v18 = vpop.xlane.xlu0 %892  ;;  %v891_v19 = vpop.xlane.xlu1 %890 }
 0xd38   : > { %v895_v20 = vcvt.f32.s32 %v893_v18  ;;  %v894_v22 = vcvt.f32.s32 %v891_v19 }
 0xd3a   : > { %v896_v21 = vshll.u32 %v895_v20, 16 }
 0xd3c   : > { %v897_v23 = vadd.s32 %v896_v21, %v894_v22 }
 0xd3e   : > { %v898_v24 = vrot.slane %v897_v23, 4 }
 0xd40   : > { %v899_v25 = vadd.s32 %v898_v24, %v897_v23 }
 0xd42   : > { %v900_v26 = vrot.slane %v899_v25, 2 }
 0xd44   : > { %v901_v27 = vadd.s32 %v900_v26, %v899_v25 }
 0xd46   : > { %v902_v28 = vrot.slane %v901_v27, 1 }
 0xd48   : > { %v903_v29 = vadd.s32 %v902_v28, %v901_v27 }
 0xd4a   : > { %1583 = vpush %v903_v29 }
 0xd7b   : > { %s1584_s22 = spop %1583 }
 0xd7c   : > { %p905_p6 = scmp.ge.s32.totalorder %s1584_s22, %s2281_s10 }
 0xd7e   : > { %s2309_s21 = smov (!%p905_p6, %s877_s21), %s2307_s19 }
 0xd7f   : > { %s907_s23 = sor.u32 32768, %s2309_s21 }
 0xd80   : > { %v908_v30 = vstv %s907_s23 }
 0xd81   : > { %vm909_vm15 = vcmp.ge.s32.totalorder %v1777_v13, %v908_v30  ;;  %vm910_vm2 = vcmp.ge.s32.totalorder %v1780_v11, %v908_v30 }
 0xd82   : > { %v911_v31 = vsel %vm909_vm15, 1, %v1656_v5  ;;  %v912_v32 = vsel %vm910_vm2, 1, %v1656_v5 }
 0xd83   : > { %v913_v33 = vsel %vm274_vm1, %v911_v31, 0  ;;  %v914_v36 = vsel %vm274_vm1, %v912_v32, 0 }
 0xd84   : > { %v915_v37 = vadd.s32 %v914_v36, %v913_v33 }
 0xd86   : > { %v917_v38 = vshrl.u32 %v915_v37, 16  ;;  %v916_v39 = vand.u32 65535, %v915_v37 }
 0xd88   : > { %v919_v40 = vcvt.s32.f32 %v917_v38  ;;  %v918_v41 = vcvt.s32.f32 %v916_v39 }
 0xd8a   : > { %922 = vadd.xlane.f32.xlu0 %v919_v40  ;;  %920 = vadd.xlane.f32.xlu1 %v918_v41 }
 0xe17   : > { %v923_v42 = vpop.xlane.xlu0 %922  ;;  %v921_v43 = vpop.xlane.xlu1 %920 }
 0xe18   : > { %v925_v44 = vcvt.f32.s32 %v923_v42  ;;  %v924_v46 = vcvt.f32.s32 %v921_v43 }
 0xe1a   : > { %v926_v45 = vshll.u32 %v925_v44, 16 }
 0xe1c   : > { %v927_v47 = vadd.s32 %v926_v45, %v924_v46 }
 0xe1e   : > { %v928_v48 = vrot.slane %v927_v47, 4 }
 0xe20   : > { %v929_v49 = vadd.s32 %v928_v48, %v927_v47 }
 0xe22   : > { %v930_v50 = vrot.slane %v929_v49, 2 }
 0xe24   : > { %v931_v51 = vadd.s32 %v930_v50, %v929_v49 }
 0xe26   : > { %v932_v52 = vrot.slane %v931_v51, 1 }
 0xe28   : > { %v933_v53 = vadd.s32 %v932_v52, %v931_v51 }
 0xe2a   : > { %1585 = vpush %v933_v53 }
 0xe5b   : > { %s1586_s24 = spop %1585 }
 0xe5c   : > { %p935_p7 = scmp.ge.s32.totalorder %s1586_s24, %s2281_s10 }
 0xe5e   : > { %s2311_s23 = smov (!%p935_p7, %s907_s23), %s2309_s21 }
 0xe5f   : > { %s937_s25 = sor.u32 16384, %s2311_s23 }
 0xe60   : > { %v938_v54 = vstv %s937_s25 }
 0xe61   : > { %vm939_vm3 = vcmp.ge.s32.totalorder %v1777_v13, %v938_v54  ;;  %vm940_vm4 = vcmp.ge.s32.totalorder %v1780_v11, %v938_v54 }
 0xe62   : > { %v941_v55 = vsel %vm939_vm3, 1, %v1656_v5  ;;  %v942_v56 = vsel %vm940_vm4, 1, %v1656_v5 }
 0xe63   : > { %v943_v57 = vsel %vm274_vm1, %v941_v55, 0  ;;  %v944_v59 = vsel %vm274_vm1, %v942_v56, 0 }
 0xe64   : > { %v945_v60 = vadd.s32 %v944_v59, %v943_v57 }
 0xe66   : > { %v947_v61 = vshrl.u32 %v945_v60, 16  ;;  %v946_v62 = vand.u32 65535, %v945_v60 }
 0xe68   : > { %v949_v63 = vcvt.s32.f32 %v947_v61  ;;  %v948_v6 = vcvt.s32.f32 %v946_v62 }
 0xe6a   : > { %952 = vadd.xlane.f32.xlu0 %v949_v63  ;;  %950 = vadd.xlane.f32.xlu1 %v948_v6 }
 0xef7   : > { %v953_v35 = vpop.xlane.xlu0 %952  ;;  %v951_v9 = vpop.xlane.xlu1 %950 }
 0xef8   : > { %v955_v1 = vcvt.f32.s32 %v953_v35  ;;  %v954_v14 = vcvt.f32.s32 %v951_v9 }
 0xefa   : > { %v956_v10 = vshll.u32 %v955_v1, 16 }
 0xefc   : > { %v957_v12 = vadd.s32 %v956_v10, %v954_v14 }
 0xefe   : > { %v958_v15 = vrot.slane %v957_v12, 4 }
 0xf00   : > { %v959_v7 = vadd.s32 %v958_v15, %v957_v12 }
 0xf02   : > { %v960_v16 = vrot.slane %v959_v7, 2 }
 0xf04   : > { %v961_v17 = vadd.s32 %v960_v16, %v959_v7 }
 0xf06   : > { %v962_v8 = vrot.slane %v961_v17, 1 }
 0xf08   : > { %v963_v18 = vadd.s32 %v962_v8, %v961_v17 }
 0xf0a   : > { %1587 = vpush %v963_v18 }
 0xf3b   : > { %s1588_s26 = spop %1587 }
 0xf3c   : > { %p965_p8 = scmp.ge.s32.totalorder %s1588_s26, %s2281_s10 }
 0xf3e   : > { %s2313_s25 = smov (!%p965_p8, %s937_s25), %s2311_s23 }
 0xf3f   : > { %s967_s27 = sor.u32 8192, %s2313_s25 }
 0xf40   : > { %v968_v19 = vstv %s967_s27 }
 0xf41   : > { %vm969_vm5 = vcmp.ge.s32.totalorder %v1777_v13, %v968_v19  ;;  %vm970_vm6 = vcmp.ge.s32.totalorder %v1780_v11, %v968_v19 }
 0xf42   : > { %v971_v20 = vsel %vm969_vm5, 1, %v1656_v5  ;;  %v972_v21 = vsel %vm970_vm6, 1, %v1656_v5 }
 0xf43   : > { %v973_v22 = vsel %vm274_vm1, %v971_v20, 0  ;;  %v974_v23 = vsel %vm274_vm1, %v972_v21, 0 }
 0xf44   : > { %v975_v24 = vadd.s32 %v974_v23, %v973_v22 }
 0xf46   : > { %v977_v25 = vshrl.u32 %v975_v24, 16  ;;  %v976_v26 = vand.u32 65535, %v975_v24 }
 0xf48   : > { %v979_v27 = vcvt.s32.f32 %v977_v25  ;;  %v978_v28 = vcvt.s32.f32 %v976_v26 }
 0xf4a   : > { %982 = vadd.xlane.f32.xlu0 %v979_v27  ;;  %980 = vadd.xlane.f32.xlu1 %v978_v28 }
 0xfd7   : > { %v983_v29 = vpop.xlane.xlu0 %982  ;;  %v981_v30 = vpop.xlane.xlu1 %980 }
 0xfd8   : > { %v985_v31 = vcvt.f32.s32 %v983_v29  ;;  %v984_v33 = vcvt.f32.s32 %v981_v30 }
 0xfda   : > { %v986_v32 = vshll.u32 %v985_v31, 16 }
 0xfdc   : > { %v987_v36 = vadd.s32 %v986_v32, %v984_v33 }
 0xfde   : > { %v988_v37 = vrot.slane %v987_v36, 4 }
 0xfe0   : > { %v989_v38 = vadd.s32 %v988_v37, %v987_v36 }
 0xfe2   : > { %v990_v39 = vrot.slane %v989_v38, 2 }
 0xfe4   : > { %v991_v40 = vadd.s32 %v990_v39, %v989_v38 }
 0xfe6   : > { %v992_v41 = vrot.slane %v991_v40, 1 }
 0xfe8   : > { %v993_v42 = vadd.s32 %v992_v41, %v991_v40 }
 0xfea   : > { %1589 = vpush %v993_v42 }
0x101b   : > { %s1590_s28 = spop %1589 }
0x101c   : > { %p995_p9 = scmp.ge.s32.totalorder %s1590_s28, %s2281_s10 }
0x101e   : > { %s2315_s27 = smov (!%p995_p9, %s967_s27), %s2313_s25 }
0x101f   : > { %s997_s29 = sor.u32 4096, %s2315_s27 }
0x1020   : > { %v998_v43 = vstv %s997_s29 }
0x1021   : > { %vm999_vm7 = vcmp.ge.s32.totalorder %v1777_v13, %v998_v43  ;;  %vm1000_vm8 = vcmp.ge.s32.totalorder %v1780_v11, %v998_v43 }
0x1022   : > { %v1001_v44 = vsel %vm999_vm7, 1, %v1656_v5  ;;  %v1002_v45 = vsel %vm1000_vm8, 1, %v1656_v5 }
0x1023   : > { %v1003_v46 = vsel %vm274_vm1, %v1001_v44, 0  ;;  %v1004_v47 = vsel %vm274_vm1, %v1002_v45, 0 }
0x1024   : > { %v1005_v48 = vadd.s32 %v1004_v47, %v1003_v46 }
0x1026   : > { %v1007_v49 = vshrl.u32 %v1005_v48, 16  ;;  %v1006_v50 = vand.u32 65535, %v1005_v48 }
0x1028   : > { %v1009_v51 = vcvt.s32.f32 %v1007_v49  ;;  %v1008_v52 = vcvt.s32.f32 %v1006_v50 }
0x102a   : > { %1012 = vadd.xlane.f32.xlu0 %v1009_v51  ;;  %1010 = vadd.xlane.f32.xlu1 %v1008_v52 }
0x10b7   : > { %v1013_v53 = vpop.xlane.xlu0 %1012  ;;  %v1011_v54 = vpop.xlane.xlu1 %1010 }
0x10b8   : > { %v1015_v55 = vcvt.f32.s32 %v1013_v53  ;;  %v1014_v57 = vcvt.f32.s32 %v1011_v54 }
0x10ba   : > { %v1016_v56 = vshll.u32 %v1015_v55, 16 }
0x10bc   : > { %v1017_v59 = vadd.s32 %v1016_v56, %v1014_v57 }
0x10be   : > { %v1018_v60 = vrot.slane %v1017_v59, 4 }
0x10c0   : > { %v1019_v61 = vadd.s32 %v1018_v60, %v1017_v59 }
0x10c2   : > { %v1020_v62 = vrot.slane %v1019_v61, 2 }
0x10c4   : > { %v1021_v63 = vadd.s32 %v1020_v62, %v1019_v61 }
0x10c6   : > { %v1022_v6 = vrot.slane %v1021_v63, 1 }
0x10c8   : > { %v1023_v35 = vadd.s32 %v1022_v6, %v1021_v63 }
0x10ca   : > { %1591 = vpush %v1023_v35 }
0x10fb   : > { %s1592_s30 = spop %1591 }
0x10fc   : > { %p1025_p10 = scmp.ge.s32.totalorder %s1592_s30, %s2281_s10 }
0x10fe   : > { %s2317_s29 = smov (!%p1025_p10, %s997_s29), %s2315_s27 }
0x10ff   : > { %s1027_s5 = sor.u32 2048, %s2317_s29 }
0x1100   : > { %v1028_v9 = vstv %s1027_s5 }
0x1101   : > { %vm1029_vm9 = vcmp.ge.s32.totalorder %v1777_v13, %v1028_v9  ;;  %vm1030_vm10 = vcmp.ge.s32.totalorder %v1780_v11, %v1028_v9 }
0x1102   : > { %v1031_v1 = vsel %vm1029_vm9, 1, %v1656_v5  ;;  %v1032_v10 = vsel %vm1030_vm10, 1, %v1656_v5 }
0x1103   : > { %v1033_v14 = vsel %vm274_vm1, %v1031_v1, 0  ;;  %v1034_v12 = vsel %vm274_vm1, %v1032_v10, 0 }
0x1104   : > { %v1035_v15 = vadd.s32 %v1034_v12, %v1033_v14 }
0x1106   : > { %v1037_v7 = vshrl.u32 %v1035_v15, 16  ;;  %v1036_v16 = vand.u32 65535, %v1035_v15 }
0x1108   : > { %v1039_v17 = vcvt.s32.f32 %v1037_v7  ;;  %v1038_v8 = vcvt.s32.f32 %v1036_v16 }
0x110a   : > { %1042 = vadd.xlane.f32.xlu0 %v1039_v17  ;;  %1040 = vadd.xlane.f32.xlu1 %v1038_v8 }
0x1197   : > { %v1043_v18 = vpop.xlane.xlu0 %1042  ;;  %v1041_v19 = vpop.xlane.xlu1 %1040 }
0x1198   : > { %v1045_v20 = vcvt.f32.s32 %v1043_v18  ;;  %v1044_v22 = vcvt.f32.s32 %v1041_v19 }
0x119a   : > { %v1046_v21 = vshll.u32 %v1045_v20, 16 }
0x119c   : > { %v1047_v23 = vadd.s32 %v1046_v21, %v1044_v22 }
0x119e   : > { %v1048_v24 = vrot.slane %v1047_v23, 4 }
0x11a0   : > { %v1049_v25 = vadd.s32 %v1048_v24, %v1047_v23 }
0x11a2   : > { %v1050_v26 = vrot.slane %v1049_v25, 2 }
0x11a4   : > { %v1051_v27 = vadd.s32 %v1050_v26, %v1049_v25 }
0x11a6   : > { %v1052_v28 = vrot.slane %v1051_v27, 1 }
0x11a8   : > { %v1053_v29 = vadd.s32 %v1052_v28, %v1051_v27 }
0x11aa   : > { %1593 = vpush %v1053_v29 }
0x11db   : > { %s1594_s7 = spop %1593 }
0x11dc   : > { %p1055_p11 = scmp.ge.s32.totalorder %s1594_s7, %s2281_s10 }
0x11de   : > { %s2319_s5 = smov (!%p1055_p11, %s1027_s5), %s2317_s29 }
0x11df   : > { %s1057_s8 = sor.u32 1024, %s2319_s5 }
0x11e0   : > { %v1058_v30 = vstv %s1057_s8 }
0x11e1   : > { %vm1059_vm11 = vcmp.ge.s32.totalorder %v1777_v13, %v1058_v30  ;;  %vm1060_vm12 = vcmp.ge.s32.totalorder %v1780_v11, %v1058_v30 }
0x11e2   : > { %v1061_v31 = vsel %vm1059_vm11, 1, %v1656_v5  ;;  %v1062_v32 = vsel %vm1060_vm12, 1, %v1656_v5 }
0x11e3   : > { %v1063_v33 = vsel %vm274_vm1, %v1061_v31, 0  ;;  %v1064_v36 = vsel %vm274_vm1, %v1062_v32, 0 }
0x11e4   : > { %v1065_v37 = vadd.s32 %v1064_v36, %v1063_v33 }
0x11e6   : > { %v1067_v38 = vshrl.u32 %v1065_v37, 16  ;;  %v1066_v39 = vand.u32 65535, %v1065_v37 }
0x11e8   : > { %v1069_v40 = vcvt.s32.f32 %v1067_v38  ;;  %v1068_v41 = vcvt.s32.f32 %v1066_v39 }
0x11ea   : > { %1072 = vadd.xlane.f32.xlu0 %v1069_v40  ;;  %1070 = vadd.xlane.f32.xlu1 %v1068_v41 }
0x1277   : > { %v1073_v42 = vpop.xlane.xlu0 %1072  ;;  %v1071_v43 = vpop.xlane.xlu1 %1070 }
0x1278   : > { %v1075_v44 = vcvt.f32.s32 %v1073_v42  ;;  %v1074_v46 = vcvt.f32.s32 %v1071_v43 }
0x127a   : > { %v1076_v45 = vshll.u32 %v1075_v44, 16 }
0x127c   : > { %v1077_v47 = vadd.s32 %v1076_v45, %v1074_v46 }
0x127e   : > { %v1078_v48 = vrot.slane %v1077_v47, 4 }
0x1280   : > { %v1079_v49 = vadd.s32 %v1078_v48, %v1077_v47 }
0x1282   : > { %v1080_v50 = vrot.slane %v1079_v49, 2 }
0x1284   : > { %v1081_v51 = vadd.s32 %v1080_v50, %v1079_v49 }
0x1286   : > { %v1082_v52 = vrot.slane %v1081_v51, 1 }
0x1288   : > { %v1083_v53 = vadd.s32 %v1082_v52, %v1081_v51 }
0x128a   : > { %1595 = vpush %v1083_v53 }
0x12bb   : > { %s1596_s9 = spop %1595 }
0x12bc   : > { %p1085_p12 = scmp.ge.s32.totalorder %s1596_s9, %s2281_s10 }
0x12be   : > { %s2321_s8 = smov (!%p1085_p12, %s1057_s8), %s2319_s5 }
0x12bf   : > { %s1087_s12 = sor.u32 512, %s2321_s8 }
0x12c0   : > { %v1088_v54 = vstv %s1087_s12 }
0x12c1   : > { %vm1089_vm13 = vcmp.ge.s32.totalorder %v1777_v13, %v1088_v54  ;;  %vm1090_vm14 = vcmp.ge.s32.totalorder %v1780_v11, %v1088_v54 }
0x12c2   : > { %v1091_v55 = vsel %vm1089_vm13, 1, %v1656_v5  ;;  %v1092_v56 = vsel %vm1090_vm14, 1, %v1656_v5 }
0x12c3   : > { %v1093_v57 = vsel %vm274_vm1, %v1091_v55, 0  ;;  %v1094_v59 = vsel %vm274_vm1, %v1092_v56, 0 }
0x12c4   : > { %v1095_v60 = vadd.s32 %v1094_v59, %v1093_v57 }
0x12c6   : > { %v1097_v61 = vshrl.u32 %v1095_v60, 16  ;;  %v1096_v62 = vand.u32 65535, %v1095_v60 }
0x12c8   : > { %v1099_v63 = vcvt.s32.f32 %v1097_v61  ;;  %v1098_v6 = vcvt.s32.f32 %v1096_v62 }
0x12ca   : > { %1102 = vadd.xlane.f32.xlu0 %v1099_v63  ;;  %1100 = vadd.xlane.f32.xlu1 %v1098_v6 }
0x1357   : > { %v1103_v35 = vpop.xlane.xlu0 %1102  ;;  %v1101_v9 = vpop.xlane.xlu1 %1100 }
0x1358   : > { %v1105_v1 = vcvt.f32.s32 %v1103_v35  ;;  %v1104_v14 = vcvt.f32.s32 %v1101_v9 }
0x135a   : > { %v1106_v10 = vshll.u32 %v1105_v1, 16 }
0x135c   : > { %v1107_v12 = vadd.s32 %v1106_v10, %v1104_v14 }
0x135e   : > { %v1108_v15 = vrot.slane %v1107_v12, 4 }
0x1360   : > { %v1109_v7 = vadd.s32 %v1108_v15, %v1107_v12 }
0x1362   : > { %v1110_v16 = vrot.slane %v1109_v7, 2 }
0x1364   : > { %v1111_v17 = vadd.s32 %v1110_v16, %v1109_v7 }
0x1366   : > { %v1112_v8 = vrot.slane %v1111_v17, 1 }
0x1368   : > { %v1113_v18 = vadd.s32 %v1112_v8, %v1111_v17 }
0x136a   : > { %1597 = vpush %v1113_v18 }
0x139b   : > { %s1598_s13 = spop %1597 }
0x139c   : > { %p1115_p13 = scmp.ge.s32.totalorder %s1598_s13, %s2281_s10  ;;  %s250_s13 = scalar_lea.vmem %s2275_s4, %s2277_s16 }
0x139e   : > { %s2323_s12 = smov (!%p1115_p13, %s1087_s12), %s2321_s8 }
0x139f   : > { %s1117_s14 = sor.u32 256, %s2323_s12 }
0x13a0   : > { %v1118_v19 = vstv %s1117_s14 }
0x13a1   : > { %vm1119_vm15 = vcmp.ge.s32.totalorder %v1777_v13, %v1118_v19  ;;  %vm1120_vm2 = vcmp.ge.s32.totalorder %v1780_v11, %v1118_v19 }
0x13a2   : > { %v1121_v20 = vsel %vm1119_vm15, 1, %v1656_v5  ;;  %v1122_v21 = vsel %vm1120_vm2, 1, %v1656_v5 }
0x13a3   : > { %v1123_v22 = vsel %vm274_vm1, %v1121_v20, 0  ;;  %v1124_v23 = vsel %vm274_vm1, %v1122_v21, 0 }
0x13a4   : > { %v1125_v24 = vadd.s32 %v1124_v23, %v1123_v22 }
0x13a6   : > { %v1127_v25 = vshrl.u32 %v1125_v24, 16  ;;  %v1126_v26 = vand.u32 65535, %v1125_v24 }
0x13a8   : > { %v1129_v27 = vcvt.s32.f32 %v1127_v25  ;;  %v1128_v28 = vcvt.s32.f32 %v1126_v26 }
0x13aa   : > { %1132 = vadd.xlane.f32.xlu0 %v1129_v27  ;;  %1130 = vadd.xlane.f32.xlu1 %v1128_v28 }
0x1437   : > { %v1133_v29 = vpop.xlane.xlu0 %1132  ;;  %v1131_v30 = vpop.xlane.xlu1 %1130 }
0x1438   : > { %v1135_v31 = vcvt.f32.s32 %v1133_v29  ;;  %v1134_v33 = vcvt.f32.s32 %v1131_v30 }
0x143a   : > { %v1136_v32 = vshll.u32 %v1135_v31, 16 }
0x143c   : > { %v1137_v36 = vadd.s32 %v1136_v32, %v1134_v33 }
0x143e   : > { %v1138_v37 = vrot.slane %v1137_v36, 4 }
0x1440   : > { %v1139_v38 = vadd.s32 %v1138_v37, %v1137_v36 }
0x1442   : > { %v1140_v39 = vrot.slane %v1139_v38, 2 }
0x1444   : > { %v1141_v40 = vadd.s32 %v1140_v39, %v1139_v38 }
0x1446   : > { %v1142_v41 = vrot.slane %v1141_v40, 1 }
0x1448   : > { %v1143_v42 = vadd.s32 %v1142_v41, %v1141_v40 }
0x144a   : > { %1599 = vpush %v1143_v42 }
0x147b   : > { %s1600_s17 = spop %1599 }
0x147c   : > { %p1145_p0 = scmp.ge.s32.totalorder %s1600_s17, %s2281_s10 }
0x147e   : > { %s2325_s14 = smov (!%p1145_p0, %s1117_s14), %s2323_s12 }
0x147f   : > { %s1147_s18 = sor.u32 128, %s2325_s14 }
0x1480   : > { %v1148_v43 = vstv %s1147_s18 }
0x1481   : > { %vm1149_vm3 = vcmp.ge.s32.totalorder %v1777_v13, %v1148_v43  ;;  %vm1150_vm4 = vcmp.ge.s32.totalorder %v1780_v11, %v1148_v43 }
0x1482   : > { %v1151_v44 = vsel %vm1149_vm3, 1, %v1656_v5  ;;  %v1152_v45 = vsel %vm1150_vm4, 1, %v1656_v5 }
0x1483   : > { %v1153_v46 = vsel %vm274_vm1, %v1151_v44, 0  ;;  %v1154_v47 = vsel %vm274_vm1, %v1152_v45, 0 }
0x1484   : > { %v1155_v48 = vadd.s32 %v1154_v47, %v1153_v46 }
0x1486   : > { %v1157_v49 = vshrl.u32 %v1155_v48, 16  ;;  %v1156_v50 = vand.u32 65535, %v1155_v48 }
0x1488   : > { %v1159_v51 = vcvt.s32.f32 %v1157_v49  ;;  %v1158_v52 = vcvt.s32.f32 %v1156_v50 }
0x148a   : > { %1162 = vadd.xlane.f32.xlu0 %v1159_v51  ;;  %1160 = vadd.xlane.f32.xlu1 %v1158_v52 }
0x1517   : > { %v1163_v53 = vpop.xlane.xlu0 %1162  ;;  %v1161_v54 = vpop.xlane.xlu1 %1160 }
0x1518   : > { %v1165_v55 = vcvt.f32.s32 %v1163_v53  ;;  %v1164_v57 = vcvt.f32.s32 %v1161_v54 }
0x151a   : > { %v1166_v56 = vshll.u32 %v1165_v55, 16 }
0x151c   : > { %v1167_v59 = vadd.s32 %v1166_v56, %v1164_v57 }
0x151e   : > { %v1168_v60 = vrot.slane %v1167_v59, 4 }
0x1520   : > { %v1169_v61 = vadd.s32 %v1168_v60, %v1167_v59 }
0x1522   : > { %v1170_v62 = vrot.slane %v1169_v61, 2 }
0x1524   : > { %v1171_v63 = vadd.s32 %v1170_v62, %v1169_v61 }
0x1526   : > { %v1172_v6 = vrot.slane %v1171_v63, 1 }
0x1528   : > { %v1173_v35 = vadd.s32 %v1172_v6, %v1171_v63 }
0x152a   : > { %1601 = vpush %v1173_v35 }
0x155b   : > { %s1602_s19 = spop %1601 }
0x155c   : > { %p1175_p1 = scmp.ge.s32.totalorder %s1602_s19, %s2281_s10 }
0x155e   : > { %s2327_s18 = smov (!%p1175_p1, %s1147_s18), %s2325_s14 }
0x155f   : > { %s1177_s20 = sor.u32 64, %s2327_s18 }
0x1560   : > { %v1178_v9 = vstv %s1177_s20 }
0x1561   : > { %vm1179_vm5 = vcmp.ge.s32.totalorder %v1777_v13, %v1178_v9  ;;  %vm1180_vm6 = vcmp.ge.s32.totalorder %v1780_v11, %v1178_v9 }
0x1562   : > { %v1181_v1 = vsel %vm1179_vm5, 1, %v1656_v5  ;;  %v1182_v10 = vsel %vm1180_vm6, 1, %v1656_v5 }
0x1563   : > { %v1183_v14 = vsel %vm274_vm1, %v1181_v1, 0  ;;  %v1184_v12 = vsel %vm274_vm1, %v1182_v10, 0 }
0x1564   : > { %v1185_v15 = vadd.s32 %v1184_v12, %v1183_v14 }
0x1566   : > { %v1187_v7 = vshrl.u32 %v1185_v15, 16  ;;  %v1186_v16 = vand.u32 65535, %v1185_v15 }
0x1568   : > { %v1189_v17 = vcvt.s32.f32 %v1187_v7  ;;  %v1188_v8 = vcvt.s32.f32 %v1186_v16 }
0x156a   : > { %1192 = vadd.xlane.f32.xlu0 %v1189_v17  ;;  %1190 = vadd.xlane.f32.xlu1 %v1188_v8 }
0x15f7   : > { %v1193_v18 = vpop.xlane.xlu0 %1192  ;;  %v1191_v19 = vpop.xlane.xlu1 %1190 }
0x15f8   : > { %v1195_v20 = vcvt.f32.s32 %v1193_v18  ;;  %v1194_v22 = vcvt.f32.s32 %v1191_v19 }
0x15fa   : > { %v1196_v21 = vshll.u32 %v1195_v20, 16 }
0x15fc   : > { %v1197_v23 = vadd.s32 %v1196_v21, %v1194_v22 }
0x15fe   : > { %v1198_v24 = vrot.slane %v1197_v23, 4 }
0x1600   : > { %v1199_v25 = vadd.s32 %v1198_v24, %v1197_v23 }
0x1602   : > { %v1200_v26 = vrot.slane %v1199_v25, 2 }
0x1604   : > { %v1201_v27 = vadd.s32 %v1200_v26, %v1199_v25 }
0x1606   : > { %v1202_v28 = vrot.slane %v1201_v27, 1 }
0x1608   : > { %v1203_v29 = vadd.s32 %v1202_v28, %v1201_v27 }
0x160a   : > { %1603 = vpush %v1203_v29 }
0x163b   : > { %s1604_s21 = spop %1603 }
0x163c   : > { %p1205_p2 = scmp.ge.s32.totalorder %s1604_s21, %s2281_s10 }
0x163e   : > { %s2329_s20 = smov (!%p1205_p2, %s1177_s20), %s2327_s18 }
0x163f   : > { %s1207_s22 = sor.u32 32, %s2329_s20 }
0x1640   : > { %v1208_v30 = vstv %s1207_s22 }
0x1641   : > { %vm1209_vm7 = vcmp.ge.s32.totalorder %v1777_v13, %v1208_v30  ;;  %vm1210_vm8 = vcmp.ge.s32.totalorder %v1780_v11, %v1208_v30 }
0x1642   : > { %v1211_v31 = vsel %vm1209_vm7, 1, %v1656_v5  ;;  %v1212_v32 = vsel %vm1210_vm8, 1, %v1656_v5 }
0x1643   : > { %v1213_v33 = vsel %vm274_vm1, %v1211_v31, 0  ;;  %v1214_v36 = vsel %vm274_vm1, %v1212_v32, 0 }
0x1644   : > { %v1215_v37 = vadd.s32 %v1214_v36, %v1213_v33 }
0x1646   : > { %v1217_v38 = vshrl.u32 %v1215_v37, 16  ;;  %v1216_v39 = vand.u32 65535, %v1215_v37 }
0x1648   : > { %v1219_v40 = vcvt.s32.f32 %v1217_v38  ;;  %v1218_v41 = vcvt.s32.f32 %v1216_v39 }
0x164a   : > { %1222 = vadd.xlane.f32.xlu0 %v1219_v40  ;;  %1220 = vadd.xlane.f32.xlu1 %v1218_v41 }
0x16d7   : > { %v1223_v42 = vpop.xlane.xlu0 %1222  ;;  %v1221_v43 = vpop.xlane.xlu1 %1220 }
0x16d8   : > { %v1225_v44 = vcvt.f32.s32 %v1223_v42  ;;  %v1224_v46 = vcvt.f32.s32 %v1221_v43 }
0x16da   : > { %v1226_v45 = vshll.u32 %v1225_v44, 16 }
0x16dc   : > { %v1227_v47 = vadd.s32 %v1226_v45, %v1224_v46 }
0x16de   : > { %v1228_v48 = vrot.slane %v1227_v47, 4 }
0x16e0   : > { %v1229_v49 = vadd.s32 %v1228_v48, %v1227_v47 }
0x16e2   : > { %v1230_v50 = vrot.slane %v1229_v49, 2 }
0x16e4   : > { %v1231_v51 = vadd.s32 %v1230_v50, %v1229_v49 }
0x16e6   : > { %v1232_v52 = vrot.slane %v1231_v51, 1 }
0x16e8   : > { %v1233_v53 = vadd.s32 %v1232_v52, %v1231_v51 }
0x16ea   : > { %1605 = vpush %v1233_v53 }
0x171b   : > { %s1606_s23 = spop %1605 }
0x171c   : > { %p1235_p3 = scmp.ge.s32.totalorder %s1606_s23, %s2281_s10 }
0x171e   : > { %s2331_s22 = smov (!%p1235_p3, %s1207_s22), %s2329_s20 }
0x171f   : > { %s1237_s24 = sor.u32 16, %s2331_s22 }
0x1720   : > { %v1238_v54 = vstv %s1237_s24 }
0x1721   : > { %vm1239_vm9 = vcmp.ge.s32.totalorder %v1777_v13, %v1238_v54  ;;  %vm1240_vm10 = vcmp.ge.s32.totalorder %v1780_v11, %v1238_v54 }
0x1722   : > { %v1241_v55 = vsel %vm1239_vm9, 1, %v1656_v5  ;;  %v1242_v56 = vsel %vm1240_vm10, 1, %v1656_v5 }
0x1723   : > { %v1243_v57 = vsel %vm274_vm1, %v1241_v55, 0  ;;  %v1244_v59 = vsel %vm274_vm1, %v1242_v56, 0 }
0x1724   : > { %v1245_v60 = vadd.s32 %v1244_v59, %v1243_v57 }
0x1726   : > { %v1247_v61 = vshrl.u32 %v1245_v60, 16  ;;  %v1246_v62 = vand.u32 65535, %v1245_v60 }
0x1728   : > { %v1249_v63 = vcvt.s32.f32 %v1247_v61  ;;  %v1248_v6 = vcvt.s32.f32 %v1246_v62 }
0x172a   : > { %1252 = vadd.xlane.f32.xlu0 %v1249_v63  ;;  %1250 = vadd.xlane.f32.xlu1 %v1248_v6 }
0x17b7   : > { %v1253_v35 = vpop.xlane.xlu0 %1252  ;;  %v1251_v9 = vpop.xlane.xlu1 %1250 }
0x17b8   : > { %v1255_v1 = vcvt.f32.s32 %v1253_v35  ;;  %v1254_v14 = vcvt.f32.s32 %v1251_v9 }
0x17ba   : > { %v1256_v10 = vshll.u32 %v1255_v1, 16 }
0x17bc   : > { %v1257_v12 = vadd.s32 %v1256_v10, %v1254_v14 }
0x17be   : > { %v1258_v15 = vrot.slane %v1257_v12, 4 }
0x17c0   : > { %v1259_v7 = vadd.s32 %v1258_v15, %v1257_v12 }
0x17c2   : > { %v1260_v16 = vrot.slane %v1259_v7, 2 }
0x17c4   : > { %v1261_v17 = vadd.s32 %v1260_v16, %v1259_v7 }
0x17c6   : > { %v1262_v8 = vrot.slane %v1261_v17, 1 }
0x17c8   : > { %v1263_v18 = vadd.s32 %v1262_v8, %v1261_v17 }
0x17ca   : > { %1607 = vpush %v1263_v18 }
0x17fb   : > { %s1608_s25 = spop %1607 }
0x17fc   : > { %p1265_p4 = scmp.ge.s32.totalorder %s1608_s25, %s2281_s10 }
0x17fe   : > { %s2333_s24 = smov (!%p1265_p4, %s1237_s24), %s2331_s22 }
0x17ff   : > { %s1267_s26 = sor.u32 8, %s2333_s24 }
0x1800   : > { %v1268_v19 = vstv %s1267_s26 }
0x1801   : > { %vm1269_vm11 = vcmp.ge.s32.totalorder %v1777_v13, %v1268_v19  ;;  %vm1270_vm12 = vcmp.ge.s32.totalorder %v1780_v11, %v1268_v19 }
0x1802   : > { %v1271_v20 = vsel %vm1269_vm11, 1, %v1656_v5  ;;  %v1272_v21 = vsel %vm1270_vm12, 1, %v1656_v5 }
0x1803   : > { %v1273_v22 = vsel %vm274_vm1, %v1271_v20, 0  ;;  %v1274_v23 = vsel %vm274_vm1, %v1272_v21, 0 }
0x1804   : > { %v1275_v24 = vadd.s32 %v1274_v23, %v1273_v22 }
0x1806   : > { %v1277_v25 = vshrl.u32 %v1275_v24, 16  ;;  %v1276_v26 = vand.u32 65535, %v1275_v24 }
0x1808   : > { %v1279_v27 = vcvt.s32.f32 %v1277_v25  ;;  %v1278_v28 = vcvt.s32.f32 %v1276_v26 }
0x180a   : > { %1282 = vadd.xlane.f32.xlu0 %v1279_v27  ;;  %1280 = vadd.xlane.f32.xlu1 %v1278_v28 }
0x1897   : > { %v1283_v29 = vpop.xlane.xlu0 %1282  ;;  %v1281_v30 = vpop.xlane.xlu1 %1280 }
0x1898   : > { %v1285_v31 = vcvt.f32.s32 %v1283_v29  ;;  %v1284_v33 = vcvt.f32.s32 %v1281_v30 }
0x189a   : > { %v1286_v32 = vshll.u32 %v1285_v31, 16 }
0x189c   : > { %v1287_v36 = vadd.s32 %v1286_v32, %v1284_v33 }
0x189e   : > { %v1288_v37 = vrot.slane %v1287_v36, 4 }
0x18a0   : > { %v1289_v38 = vadd.s32 %v1288_v37, %v1287_v36 }
0x18a2   : > { %v1290_v39 = vrot.slane %v1289_v38, 2 }
0x18a4   : > { %v1291_v40 = vadd.s32 %v1290_v39, %v1289_v38 }
0x18a6   : > { %v1292_v41 = vrot.slane %v1291_v40, 1 }
0x18a8   : > { %v1293_v42 = vadd.s32 %v1292_v41, %v1291_v40 }
0x18aa   : > { %1609 = vpush %v1293_v42 }
0x18db   : > { %s1610_s27 = spop %1609 }
0x18dc   : > { %p1295_p5 = scmp.ge.s32.totalorder %s1610_s27, %s2281_s10 }
0x18de   : > { %s2335_s26 = smov (!%p1295_p5, %s1267_s26), %s2333_s24 }
0x18df   : > { %s1297_s28 = sor.u32 4, %s2335_s26 }
0x18e0   : > { %v1298_v43 = vstv %s1297_s28 }
0x18e1   : > { %vm1299_vm13 = vcmp.ge.s32.totalorder %v1777_v13, %v1298_v43  ;;  %vm1300_vm14 = vcmp.ge.s32.totalorder %v1780_v11, %v1298_v43 }
0x18e2   : > { %v1301_v44 = vsel %vm1299_vm13, 1, %v1656_v5  ;;  %v1302_v45 = vsel %vm1300_vm14, 1, %v1656_v5 }
0x18e3   : > { %v1303_v46 = vsel %vm274_vm1, %v1301_v44, 0  ;;  %v1304_v47 = vsel %vm274_vm1, %v1302_v45, 0 }
0x18e4   : > { %v1305_v48 = vadd.s32 %v1304_v47, %v1303_v46 }
0x18e6   : > { %v1307_v49 = vshrl.u32 %v1305_v48, 16  ;;  %v1306_v50 = vand.u32 65535, %v1305_v48 }
0x18e8   : > { %v1309_v51 = vcvt.s32.f32 %v1307_v49  ;;  %v1308_v52 = vcvt.s32.f32 %v1306_v50 }
0x18ea   : > { %1312 = vadd.xlane.f32.xlu0 %v1309_v51  ;;  %1310 = vadd.xlane.f32.xlu1 %v1308_v52 }
0x1977   : > { %v1313_v53 = vpop.xlane.xlu0 %1312  ;;  %v1311_v54 = vpop.xlane.xlu1 %1310 }
0x1978   : > { %v1315_v55 = vcvt.f32.s32 %v1313_v53  ;;  %v1314_v57 = vcvt.f32.s32 %v1311_v54 }
0x197a   : > { %v1316_v56 = vshll.u32 %v1315_v55, 16 }
0x197c   : > { %v1317_v59 = vadd.s32 %v1316_v56, %v1314_v57 }
0x197e   : > { %v1318_v60 = vrot.slane %v1317_v59, 4 }
0x1980   : > { %v1319_v61 = vadd.s32 %v1318_v60, %v1317_v59 }
0x1982   : > { %v1320_v62 = vrot.slane %v1319_v61, 2 }
0x1984   : > { %v1321_v63 = vadd.s32 %v1320_v62, %v1319_v61 }
0x1986   : > { %v1322_v6 = vrot.slane %v1321_v63, 1 }
0x1988   : > { %v1323_v35 = vadd.s32 %v1322_v6, %v1321_v63 }
0x198a   : > { %1611 = vpush %v1323_v35 }
0x19bb   : > { %s1612_s29 = spop %1611 }
0x19bc   : > { %p1325_p6 = scmp.ge.s32.totalorder %s1612_s29, %s2281_s10 }
0x19be   : > { %s2337_s28 = smov (!%p1325_p6, %s1297_s28), %s2335_s26 }
0x19bf   : > { %s1327_s30 = sor.u32 2, %s2337_s28 }
0x19c0   : > { %v1328_v9 = vstv %s1327_s30 }
0x19c1   : > { %vm1329_vm15 = vcmp.ge.s32.totalorder %v1777_v13, %v1328_v9  ;;  %vm1330_vm2 = vcmp.ge.s32.totalorder %v1780_v11, %v1328_v9 }
0x19c2   : > { %v1331_v1 = vsel %vm1329_vm15, 1, %v1656_v5  ;;  %v1332_v10 = vsel %vm1330_vm2, 1, %v1656_v5 }
0x19c3   : > { %v1333_v14 = vsel %vm274_vm1, %v1331_v1, 0  ;;  %v1334_v12 = vsel %vm274_vm1, %v1332_v10, 0 }
0x19c4   : > { %v1335_v15 = vadd.s32 %v1334_v12, %v1333_v14  ;;  %v1442_v12 = vstv %s1795_s11 }
0x19c6   : > { %v1337_v7 = vshrl.u32 %v1335_v15, 16  ;;  %v1336_v16 = vand.u32 65535, %v1335_v15 }
0x19c8   : > { %v1339_v17 = vcvt.s32.f32 %v1337_v7  ;;  %v1338_v8 = vcvt.s32.f32 %v1336_v16 }
0x19ca   : > { %1342 = vadd.xlane.f32.xlu0 %v1339_v17  ;;  %1340 = vadd.xlane.f32.xlu1 %v1338_v8 }
0x1a57   : > { %v1343_v18 = vpop.xlane.xlu0 %1342  ;;  %v1341_v19 = vpop.xlane.xlu1 %1340 }
0x1a58   : > { %v1345_v20 = vcvt.f32.s32 %v1343_v18  ;;  %v1344_v22 = vcvt.f32.s32 %v1341_v19 }
0x1a5a   : > { %v1346_v21 = vshll.u32 %v1345_v20, 16 }
0x1a5c   : > { %v1347_v23 = vadd.s32 %v1346_v21, %v1344_v22 }
0x1a5e   : > { %v1348_v24 = vrot.slane %v1347_v23, 4 }
0x1a60   : > { %v1349_v25 = vadd.s32 %v1348_v24, %v1347_v23 }
0x1a62   : > { %v1350_v26 = vrot.slane %v1349_v25, 2 }
0x1a64   : > { %v1351_v27 = vadd.s32 %v1350_v26, %v1349_v25 }
0x1a66   : > { %v1352_v28 = vrot.slane %v1351_v27, 1 }
0x1a68   : > { %v1353_v29 = vadd.s32 %v1352_v28, %v1351_v27 }
0x1a6a   : > { %1613 = vpush %v1353_v29 }
0x1a9b   : > { %s1614_s5 = spop %1613 }
0x1a9c   : > { %p1355_p7 = scmp.ge.s32.totalorder %s1614_s5, %s2281_s10 }
0x1a9e   : > { %s2339_s30 = smov (!%p1355_p7, %s1327_s30), %s2337_s28 }
0x1a9f   : > { %s1357_s7 = sor.u32 1, %s2339_s30 }
0x1aa0   : > { %v1358_v30 = vstv %s1357_s7 }
0x1aa1   : > { %vm1359_vm3 = vcmp.ge.s32.totalorder %v1777_v13, %v1358_v30  ;;  %vm1360_vm4 = vcmp.ge.s32.totalorder %v1780_v11, %v1358_v30 }
0x1aa2   : > { %v1361_v31 = vsel %vm1359_vm3, 1, %v1656_v5  ;;  %v1362_v32 = vsel %vm1360_vm4, 1, %v1656_v5 }
0x1aa3   : > { %v1363_v33 = vsel %vm274_vm1, %v1361_v31, 0  ;;  %v1364_v36 = vsel %vm274_vm1, %v1362_v32, 0 }
0x1aa4   : > { %v1365_v37 = vadd.s32 %v1364_v36, %v1363_v33 }
0x1aa6   : > { %v1367_v38 = vshrl.u32 %v1365_v37, 16  ;;  %v1366_v39 = vand.u32 65535, %v1365_v37 }
0x1aa8   : > { %v1369_v40 = vcvt.s32.f32 %v1367_v38  ;;  %v1368_v41 = vcvt.s32.f32 %v1366_v39 }
0x1aaa   : > { %1372 = vadd.xlane.f32.xlu0 %v1369_v40  ;;  %1370 = vadd.xlane.f32.xlu1 %v1368_v41 }
0x1b37   : > { %v1373_v42 = vpop.xlane.xlu0 %1372  ;;  %v1371_v43 = vpop.xlane.xlu1 %1370 }
0x1b38   : > { %v1375_v44 = vcvt.f32.s32 %v1373_v42  ;;  %v1374_v46 = vcvt.f32.s32 %v1371_v43 }
0x1b3a   : > { %v1376_v45 = vshll.u32 %v1375_v44, 16 }
0x1b3c   : > { %v1377_v47 = vadd.s32 %v1376_v45, %v1374_v46 }
0x1b3e   : > { %v1378_v48 = vrot.slane %v1377_v47, 4 }
0x1b40   : > { %v1379_v49 = vadd.s32 %v1378_v48, %v1377_v47 }
0x1b42   : > { %v1380_v50 = vrot.slane %v1379_v49, 2 }
0x1b44   : > { %v1381_v51 = vadd.s32 %v1380_v50, %v1379_v49 }
0x1b46   : > { %v1382_v52 = vrot.slane %v1381_v51, 1 }
0x1b48   : > { %v1383_v53 = vadd.s32 %v1382_v52, %v1381_v51 }
0x1b4a   : > { %1615 = vpush %v1383_v53 }
0x1b7b   : > { %s1616_s8 = spop %1615 }
0x1b7c   : > { %p1385_p8 = scmp.ge.s32.totalorder %s1616_s8, %s2281_s10 }
0x1b7e   : > { %s2341_s7 = smov (!%p1385_p8, %s1357_s7), %s2339_s30 }
0x1b7f   : > { %v1387_v54 = vstv %s2341_s7 }
0x1b80   : > { %vm1388_vm5 = vcmp.ge.s32.totalorder %v1777_v13, %v1387_v54  ;;  %vm1389_vm6 = vcmp.ge.s32.totalorder %v1780_v11, %v1387_v54 }
0x1b81   : > { %v1390_v55 = vsel %vm1388_vm5, 1, %v1656_v5  ;;  %v1391_v56 = vsel %vm1389_vm6, 1, %v1656_v5 }
0x1b82   : > { %v1392_v57 = vcombine.low %v1390_v55, %v1391_v56 }
0x1b84   : > { %v1399_v59 = vrot.slane %v1392_v57, %v1762_v58 }
0x1b86   : > { %v1406_v60 = vrot.slane %v1399_v59, %v1762_v58 }
0x1b88   : > { %vm1407_vm7 = vcmp.ne.s32.totalorder %v1406_v60, 0 }
0x1b89   : > { %vm1408_vm8 = vmor %vm260_vm0, %vm1407_vm7 }
0x1b8a   : > { %v1409_v61 = vsel %vm1408_vm8, %v1769_v34, 0.0 }
0x1b8b   : > { %v1414_v62 = vrot.slane %v1409_v61, %v1707_v3  ;;  %v1418_v13 = vrot.slane %v1409_v61, %v1710_v4  ;;  %v1434_v3 = vand.u32 127, %v264_v0  ;;  %v1438_v4 = vstv %s1788_s6 }
0x1b8d   : > { %v1421_v11 = vsel %vm274_vm1, %v1414_v62, 0.0  ;;  %v1422_v5 = vsel %vm274_vm1, %v1418_v13, 0.0  ;;  %vm1437_vm0 = vcmp.eq.s32.totalorder %v1434_v3, 2  ;;  %vm1436_vm9 = vcmp.eq.s32.totalorder %v1434_v3, 1 }
0x1b8e   : > { %v1423_v63 = vadd.f32 %v1422_v5, %v1421_v11  ;;  %vm1435_vm10 = vcmp.eq.s32.totalorder %v1434_v3, 0  ;;  %v1439_v10 = vsel %vm1437_vm0, %v1438_v4, 0.0 }
0x1b90   : > { %1424 = vadd.xlane.f32.xlu0 %v1423_v63 }
0x1c1d   : > { %v1425_v6 = vpop.xlane.xlu0 %1424 }
0x1c1e   : > { %v1426_v58 = vrot.slane %v1425_v6, 4 }
0x1c20   : > { %v1427_v35 = vadd.f32 %v1426_v58, %v1425_v6 }
0x1c22   : > { %v1428_v2 = vrot.slane %v1427_v35, 2 }
0x1c24   : > { %v1429_v9 = vadd.f32 %v1428_v2, %v1427_v35 }
0x1c26   : > { %v1430_v1 = vrot.slane %v1429_v9, 1 }
0x1c28   : > { %v1431_v34 = vadd.f32 %v1430_v1, %v1429_v9 }
0x1c2a   : > { %1617 = vpush %v1431_v34 }
0x1c5b   : > { %s1618_s10 = spop %1617 }
0x1c5c   : > { %v1440_v14 = vstv %s1618_s10 }
0x1c5d   : > { %v1441_v15 = vsel %vm1436_vm9, %v1440_v14, %v1439_v10 }
0x1c5e   : > { %v1443_v7 = vsel %vm1435_vm10, %v1442_v12, %v1441_v15 }
0x1c5f   : > { %1444 = vst [vmem:[%s250_s13] sm:$0x1] %v1443_v7 }
0x1c60 PF: > { %s14_s15 = sadd.s32 1, %s1652_s15  }
0x1c61   : > { %p11_p9 = scmp.ge.s32.totalorder %s14_s15, 4  }
0x1c63   :  { %13 = sbr.rel (!%p11_p9) target bundleno = 1 (0x1), region = 75 }

</bundles_post_ra>
